<compile_context>
chip_gen: v5e
topology: v5e:2x2
jax: 0.10.0
libtpu: 0.0.40
codegen_flags: <defaults>
</compile_context>

<pallas_src>
import functools

import jax
import jax.numpy as jnp
from jax.experimental import pallas as pl
from jax.experimental.pallas import tpu as pltpu

NEG_SLOPE = 0.01  # nn.LeakyReLU default


def _round_up(x, m):
    return (x + m - 1) // m * m


def _pad_channel(c):
    # MXU-aligned padding for real AtlasNet sizes (512/729/1024); sublane (8)
    # alignment only for small channel counts (padding tiny configs to 128
    # would just inflate VPU work).
    return _round_up(c, 128) if c >= 128 else _round_up(c, 8)


def _leaky(x):
    return jnp.where(x > 0, x, NEG_SLOPE * x)


def _hw_config():
    """Returns (vmem_capacity_bytes, activations_in_bf16) with safe fallbacks."""
    vmem_cap = 64 * 1024 * 1024
    act_bf16 = True
    try:
        vmem_cap = int(pltpu.get_tpu_info().vmem_capacity_bytes)
    except Exception:
        pass
    try:
        kind = jax.devices()[0].device_kind.lower()
        act_bf16 = "v5" not in kind  # v5 VPU has no bf16 -> keep f32 activations
    except Exception:
        pass
    return vmem_cap, act_bf16


def _const_spec(shape):
    """Block == full array, constant index (VMEM-resident); single-buffered."""
    idx = lambda bi, fi, pi: tuple(0 for _ in shape)
    try:
        return pl.BlockSpec(shape, idx, pipeline_mode=pl.Buffered(1))
    except Exception:  # older JAX without pipeline_mode kwarg
        return pl.BlockSpec(shape, idx)


# ----------------------------------------------------------------------------
# Fused kernel: one (b, f, p-tile) output block per grid step.
# refs = [h0_tile, latent_bias_col, bias_all, w2, wl_0..wl_{L-1}, wlast, out]
# ----------------------------------------------------------------------------
def _mapping_kernel(*refs, num_layers, hp, dim_out, act_bf16):
    h0_ref, bc_ref, ball_ref = refs[0], refs[1], refs[2]
    w2 = refs[3]
    wls = refs[4:4 + num_layers]
    wlast = refs[4 + num_layers]
    o_ref = refs[-1]

    cdt = h0_ref.dtype  # bf16 matmul dtype

    # Layer 1: precomputed conv10(x) tile + per-(b,f) latent bias column
    # (conv11(latent) + b11 + b10), both computed once outside the kernel.
    if act_bf16:
        h = _leaky(h0_ref[...] + bc_ref[0, 0].astype(cdt))
    else:
        h = _leaky(h0_ref[...].astype(jnp.float32) + bc_ref[0, 0]).astype(cdt)

    def dense(w_ref, b_col, hin):
        y = jnp.dot(w_ref[...], hin, preferred_element_type=jnp.float32) + b_col
        if act_bf16:
            return _leaky(y.astype(cdt))   # packed bf16 VALU on v6e/v7x
        return _leaky(y).astype(cdt)       # f32 VPU on v5e

    off = 0
    h = dense(w2, ball_ref[off:off + hp, :], h)
    off += hp
    for i in range(num_layers):
        h = dense(wls[i], ball_ref[off:off + hp, :], h)
        off += hp

    y = (jnp.dot(wlast[...], h, preferred_element_type=jnp.float32)
         + ball_ref[off:off + dim_out, :])
    o_ref[0, 0] = (2.0 * jnp.tanh(y)).astype(o_ref.dtype)


# ----------------------------------------------------------------------------
# Wrapper
# ----------------------------------------------------------------------------
def mapping_2d_to_3d(params, x, latent, *, tile_p=None):
    """Pallas forward of Mapping2Dto3D.

    x:      (1, dim, 1, nsample)       grid points (shared by every (b, f))
    latent: (bs, latent_size, nfps, 1) latent vectors
    returns (bs, dim_out, nfps, nsample) float32
    """
    dim, nsample = x.shape[1], x.shape[3]
    bs, latent_size, nfps, _ = latent.shape
    hidden = params["conv2"][0].shape[0]
    dim_out = params["last_conv"][0].shape[0]
    num_layers = len(params["conv_list"])
    cdt = params["conv2"][0].dtype  # bf16 compute dtype
    f32 = jnp.float32

    vmem_cap, act_bf16 = _hw_config()
    # ~48 MiB on v7x (64 MiB/TC, weights duplicated per core); ~96 MiB on
    # v5e/v6e (128 MiB physical).
    vmem_limit = int(min(vmem_cap * 3 // 4, 100 * 1024 * 1024))
    if tile_p is None:
        tile_p = 1024 if vmem_cap >= 100 * 1024 * 1024 else 512

    # lane-dense point tiles (multiple of 128), padded P
    tp = min(tile_p, _round_up(nsample, 128))
    p_pad = _round_up(nsample, tp)
    n_pt = p_pad // tp

    # aligned channel padding (zero rows/cols preserve real outputs exactly)
    lp = _pad_channel(latent_size)
    hp = _pad_channel(hidden)

    w10, b10 = params["conv10"]
    w11, b11 = params["conv11"]
    w2, b2 = params["conv2"]
    wlast, blast = params["last_conv"]

    # ---- hoisted first layer: shared conv10(x), per-(b,f) conv11(latent) ----
    xg = x.reshape(dim, nsample).astype(f32)
    h0 = jnp.dot(w10.astype(f32), xg)                         # (latent_size, nsample)
    h0 = jnp.pad(h0, ((0, lp - latent_size), (0, p_pad - nsample))).astype(cdt)

    latc = latent[:, :, :, 0].astype(f32)                     # (bs, latent_size, nfps)
    bias_col = (jnp.einsum("oi,bif->bfo", w11.astype(f32), latc)
                + b11[:, 0] + b10[:, 0])                      # (bs, nfps, latent_size)
    bias_col = jnp.pad(bias_col, ((0, 0), (0, 0), (0, lp - latent_size)))
    bias_col = bias_col[..., None].astype(f32)                # (bs, nfps, lp, 1)

    # ---- padded bf16 weights + single concatenated f32 bias column ----
    def pad_w(W, co, ci):
        return jnp.pad(W, ((0, co - W.shape[0]), (0, ci - W.shape[1]))).astype(cdt)

    def pad_b(b, co):
        return jnp.pad(b, ((0, co - b.shape[0]), (0, 0))).astype(f32)

    w_args = [pad_w(w2, hp, lp)]
    biases = [pad_b(b2, hp)]
    for wl, bl in params["conv_list"]:
        w_args.append(pad_w(wl, hp, hp))
        biases.append(pad_b(bl, hp))
    w_args.append(pad_w(wlast, dim_out, hp))
    biases.append(blast.astype(f32))
    ball = jnp.concatenate(biases, axis=0)                    # (hp*(1+L)+dim_out, 1)

    in_specs = (
        [pl.BlockSpec((lp, tp), lambda bi, fi, pi: (0, pi)),              # h0 tile
         pl.BlockSpec((1, 1, lp, 1), lambda bi, fi, pi: (bi, fi, 0, 0)),  # latent bias
         _const_spec(ball.shape)]                                         # all biases
        + [_const_spec(w.shape) for w in w_args])                         # weights
    out_spec = pl.BlockSpec((1, 1, dim_out, tp),
                            lambda bi, fi, pi: (bi, fi, 0, pi))

    total_pts = bs * nfps * p_pad
    flops = 2 * total_pts * (lp * hp + num_layers * hp * hp + hp * dim_out)
    bytes_accessed = int(
        bs * nfps * h0.size * h0.dtype.itemsize          # h0 tile re-read per (b, f)
        + bias_col.size * 4 + ball.size * 4
        + sum(w.size * w.dtype.itemsize for w in w_args)
        + bs * nfps * dim_out * p_pad * 4)

    out = pl.pallas_call(
        functools.partial(_mapping_kernel, num_layers=num_layers, hp=hp,
                          dim_out=dim_out, act_bf16=act_bf16),
        # NOTE(v7x): all-parallel grid shards across both TensorCores; keep
        # bs*nfps*n_pt even (use a finer p-split if it ends up odd/tiny).
        grid=(bs, nfps, n_pt),
        in_specs=in_specs,
        out_specs=out_spec,
        out_shape=jax.ShapeDtypeStruct((bs, nfps, dim_out, p_pad), jnp.float32),
        compiler_params=pltpu.CompilerParams(
            dimension_semantics=("parallel", "parallel", "parallel"),
            vmem_limit_bytes=vmem_limit),
        cost_estimate=pl.CostEstimate(flops=flops,
                                      transcendentals=total_pts * dim_out,
                                      bytes_accessed=bytes_accessed),
    )(h0, bias_col, ball, *w_args)

    # Padded point columns hold garbage: slice BEFORE any consumer sees them.
    # (bs, nfps, dim_out, p_pad) -> (bs, dim_out, nfps, nsample)
    return jnp.transpose(out[..., :nsample], (0, 2, 1, 3))


# ----------------------------------------------------------------------------
# Parameter init (PyTorch Conv2d-like uniform bounds); weights bf16, bias f32
# ----------------------------------------------------------------------------
def init_conv(key, cout, cin, wdtype=jnp.bfloat16):
    k1, k2 = jax.random.split(key)
    bound = 1.0 / (cin ** 0.5)
    W = jax.random.uniform(k1, (cout, cin), jnp.float32, -bound, bound).astype(wdtype)
    b = jax.random.uniform(k2, (cout, 1), jnp.float32, -bound, bound)
    return W, b


def init_mapping(key, latent_size, dim, hidden, num_layers=4):
    ks = jax.random.split(key, 4 + num_layers)
    return {
        "conv10": init_conv(ks[0], latent_size, dim),
        "conv11": init_conv(ks[1], latent_size, latent_size),
        "conv2": init_conv(ks[2], hidden, latent_size),
        "conv_list": [init_conv(ks[3 + i], hidden, hidden) for i in range(num_layers)],
        "last_conv": init_conv(ks[3 + num_layers], dim, hidden),
    }


# ----------------------------------------------------------------------------
# Pure-JAX reference (f32 activations, same bf16 weights) for validation
# ----------------------------------------------------------------------------
def mapping_ref(params, x, latent):
    def conv(p, t):
        W, b = p
        return (jnp.einsum("oi,bihw->bohw", W.astype(jnp.float32),
                           t.astype(jnp.float32)) + b.reshape(1, -1, 1, 1))

    h = _leaky(conv(params["conv10"], x) + conv(params["conv11"], latent))
    h = _leaky(conv(params["conv2"], h))
    for p in params["conv_list"]:
        h = _leaky(conv(p, h))
    return 2.0 * jnp.tanh(conv(params["last_conv"], h))


# ----------------------------------------------------------------------------
# Driver
# ----------------------------------------------------------------------------
if __name__ == "__main__":
    bs, dim, latent_size, hidden, nfps, nsample = 2, 3, 32, 32, 4, 1000

    key = jax.random.PRNGKey(0)
    kp, kx, kl = jax.random.split(key, 3)
    params = init_mapping(kp, latent_size, dim, hidden)

    x = jax.random.uniform(kx, (1, dim, 1, nsample), jnp.float32, -1.0, 1.0)
    latent = jax.random.normal(kl, (bs, latent_size, nfps, 1), jnp.float32)

    fwd = jax.jit(mapping_2d_to_3d)
    out = fwd(params, x, latent)
    jax.block_until_ready(out)

    assert out.shape == (bs, dim, nfps, nsample), out.shape
    ref = mapping_ref(params, x, latent)
    err = float(jnp.max(jnp.abs(out - ref)))
    assert err < 0.2, f"max abs error vs reference: {err}"
    print("KERNEL_OK")
</pallas_src>

<mosaic_0001>
module attributes {stable_mosaic.version = 11 : i64} {
  func.func @_mapping_kernel(%arg0: i32, %arg1: i32, %arg2: i32, %arg3: memref<32x512xbf16, #tpu.memory_space<vmem>>, %arg4: memref<1x1x32x1xf32, #tpu.memory_space<vmem>>, %arg5: memref<163x1xf32, #tpu.memory_space<vmem>>, %arg6: memref<32x32xbf16, #tpu.memory_space<vmem>>, %arg7: memref<32x32xbf16, #tpu.memory_space<vmem>>, %arg8: memref<32x32xbf16, #tpu.memory_space<vmem>>, %arg9: memref<32x32xbf16, #tpu.memory_space<vmem>>, %arg10: memref<32x32xbf16, #tpu.memory_space<vmem>>, %arg11: memref<3x32xbf16, #tpu.memory_space<vmem>>, %arg12: memref<1x1x3x512xf32, #tpu.memory_space<vmem>>) attributes {dimension_semantics = [#tpu.dimension_semantics<parallel>, #tpu.dimension_semantics<parallel>, #tpu.dimension_semantics<parallel>], iteration_bounds = array<i64: 2, 4, 2>, scalar_prefetch = 0 : i64, scratch_operands = 0 : i64, tpu.core_type = #tpu.core_type<tc>, window_params = [{transform_indices = @transform_0, window_bounds = array<i64: 32, 512>}, {transform_indices = @transform_1, window_bounds = array<i64: 1, 1, 32, 1>}, {pipeline_mode = #tpu.pipeline_mode<synchronous>, transform_indices = @transform_2, window_bounds = array<i64: 163, 1>}, {pipeline_mode = #tpu.pipeline_mode<synchronous>, transform_indices = @transform_3, window_bounds = array<i64: 32, 32>}, {pipeline_mode = #tpu.pipeline_mode<synchronous>, transform_indices = @transform_4, window_bounds = array<i64: 32, 32>}, {pipeline_mode = #tpu.pipeline_mode<synchronous>, transform_indices = @transform_5, window_bounds = array<i64: 32, 32>}, {pipeline_mode = #tpu.pipeline_mode<synchronous>, transform_indices = @transform_6, window_bounds = array<i64: 32, 32>}, {pipeline_mode = #tpu.pipeline_mode<synchronous>, transform_indices = @transform_7, window_bounds = array<i64: 32, 32>}, {pipeline_mode = #tpu.pipeline_mode<synchronous>, transform_indices = @transform_8, window_bounds = array<i64: 3, 32>}, {transform_indices = @transform_9, window_bounds = array<i64: 1, 1, 3, 512>}]} {
    %c0 = arith.constant 0 : index
    %c0_0 = arith.constant 0 : index
    %0 = vector.load %arg3[%c0, %c0_0] : memref<32x512xbf16, #tpu.memory_space<vmem>>, vector<32x512xbf16>
    %c0_1 = arith.constant 0 : index
    %c0_2 = arith.constant 0 : index
    %c0_3 = arith.constant 0 : index
    %c0_4 = arith.constant 0 : index
    %1 = vector.load %arg4[%c0_1, %c0_2, %c0_3, %c0_4] : memref<1x1x32x1xf32, #tpu.memory_space<vmem>>, vector<1x1x32x1xf32>
    %2 = vector.shape_cast %1 : vector<1x1x32x1xf32> to vector<32x1xf32>
    %3 = arith.truncf %2 : vector<32x1xf32> to vector<32x1xbf16>
    %4 = vector.broadcast %3 : vector<32x1xbf16> to vector<32x512xbf16>
    %5 = arith.addf %0, %4 : vector<32x512xbf16>
    %cst = arith.constant 0.000000e+00 : bf16
    %6 = vector.broadcast %cst : bf16 to vector<32x512xbf16>
    %7 = arith.cmpf ogt, %5, %6 : vector<32x512xbf16>
    %cst_5 = arith.constant 1.000980e-02 : bf16
    %8 = vector.broadcast %cst_5 : bf16 to vector<32x512xbf16>
    %9 = arith.mulf %8, %5 : vector<32x512xbf16>
    %10 = arith.select %7, %5, %9 : vector<32x512xi1>, vector<32x512xbf16>
    %c0_6 = arith.constant 0 : index
    %c0_7 = arith.constant 0 : index
    %11 = vector.load %arg5[%c0_6, %c0_7] : memref<163x1xf32, #tpu.memory_space<vmem>>, vector<32x1xf32>
    %c0_8 = arith.constant 0 : index
    %c0_9 = arith.constant 0 : index
    %12 = vector.load %arg6[%c0_8, %c0_9] : memref<32x32xbf16, #tpu.memory_space<vmem>>, vector<32x32xbf16>
    %cst_10 = arith.constant dense<0.000000e+00> : vector<32x512xf32>
    %13 = tpu.matmul %12, %10, %cst_10 {dimension_numbers = #tpu.dot_dimension_numbers<[1], [0], [0], [1], [0, 0, 1, 1], [], []>} : vector<32x32xbf16>, vector<32x512xbf16>, vector<32x512xf32> -> vector<32x512xf32>
    %14 = vector.broadcast %11 : vector<32x1xf32> to vector<32x512xf32>
    %15 = arith.addf %13, %14 : vector<32x512xf32>
    %16 = arith.truncf %15 : vector<32x512xf32> to vector<32x512xbf16>
    %cst_11 = arith.constant 0.000000e+00 : bf16
    %17 = vector.broadcast %cst_11 : bf16 to vector<32x512xbf16>
    %18 = arith.cmpf ogt, %16, %17 : vector<32x512xbf16>
    %cst_12 = arith.constant 1.000980e-02 : bf16
    %19 = vector.broadcast %cst_12 : bf16 to vector<32x512xbf16>
    %20 = arith.mulf %19, %16 : vector<32x512xbf16>
    %21 = arith.select %18, %16, %20 : vector<32x512xi1>, vector<32x512xbf16>
    %c32 = arith.constant 32 : index
    %c0_13 = arith.constant 0 : index
    %22 = vector.load %arg5[%c32, %c0_13] : memref<163x1xf32, #tpu.memory_space<vmem>>, vector<32x1xf32>
    %c0_14 = arith.constant 0 : index
    %c0_15 = arith.constant 0 : index
    %23 = vector.load %arg7[%c0_14, %c0_15] : memref<32x32xbf16, #tpu.memory_space<vmem>>, vector<32x32xbf16>
    %cst_16 = arith.constant dense<0.000000e+00> : vector<32x512xf32>
    %24 = tpu.matmul %23, %21, %cst_16 {dimension_numbers = #tpu.dot_dimension_numbers<[1], [0], [0], [1], [0, 0, 1, 1], [], []>} : vector<32x32xbf16>, vector<32x512xbf16>, vector<32x512xf32> -> vector<32x512xf32>
    %25 = vector.broadcast %22 : vector<32x1xf32> to vector<32x512xf32>
    %26 = arith.addf %24, %25 : vector<32x512xf32>
    %27 = arith.truncf %26 : vector<32x512xf32> to vector<32x512xbf16>
    %cst_17 = arith.constant 0.000000e+00 : bf16
    %28 = vector.broadcast %cst_17 : bf16 to vector<32x512xbf16>
    %29 = arith.cmpf ogt, %27, %28 : vector<32x512xbf16>
    %cst_18 = arith.constant 1.000980e-02 : bf16
    %30 = vector.broadcast %cst_18 : bf16 to vector<32x512xbf16>
    %31 = arith.mulf %30, %27 : vector<32x512xbf16>
    %32 = arith.select %29, %27, %31 : vector<32x512xi1>, vector<32x512xbf16>
    %c64 = arith.constant 64 : index
    %c0_19 = arith.constant 0 : index
    %33 = vector.load %arg5[%c64, %c0_19] : memref<163x1xf32, #tpu.memory_space<vmem>>, vector<32x1xf32>
    %c0_20 = arith.constant 0 : index
    %c0_21 = arith.constant 0 : index
    %34 = vector.load %arg8[%c0_20, %c0_21] : memref<32x32xbf16, #tpu.memory_space<vmem>>, vector<32x32xbf16>
    %cst_22 = arith.constant dense<0.000000e+00> : vector<32x512xf32>
    %35 = tpu.matmul %34, %32, %cst_22 {dimension_numbers = #tpu.dot_dimension_numbers<[1], [0], [0], [1], [0, 0, 1, 1], [], []>} : vector<32x32xbf16>, vector<32x512xbf16>, vector<32x512xf32> -> vector<32x512xf32>
    %36 = vector.broadcast %33 : vector<32x1xf32> to vector<32x512xf32>
    %37 = arith.addf %35, %36 : vector<32x512xf32>
    %38 = arith.truncf %37 : vector<32x512xf32> to vector<32x512xbf16>
    %cst_23 = arith.constant 0.000000e+00 : bf16
    %39 = vector.broadcast %cst_23 : bf16 to vector<32x512xbf16>
    %40 = arith.cmpf ogt, %38, %39 : vector<32x512xbf16>
    %cst_24 = arith.constant 1.000980e-02 : bf16
    %41 = vector.broadcast %cst_24 : bf16 to vector<32x512xbf16>
    %42 = arith.mulf %41, %38 : vector<32x512xbf16>
    %43 = arith.select %40, %38, %42 : vector<32x512xi1>, vector<32x512xbf16>
    %c96 = arith.constant 96 : index
    %c0_25 = arith.constant 0 : index
    %44 = vector.load %arg5[%c96, %c0_25] : memref<163x1xf32, #tpu.memory_space<vmem>>, vector<32x1xf32>
    %c0_26 = arith.constant 0 : index
    %c0_27 = arith.constant 0 : index
    %45 = vector.load %arg9[%c0_26, %c0_27] : memref<32x32xbf16, #tpu.memory_space<vmem>>, vector<32x32xbf16>
    %cst_28 = arith.constant dense<0.000000e+00> : vector<32x512xf32>
    %46 = tpu.matmul %45, %43, %cst_28 {dimension_numbers = #tpu.dot_dimension_numbers<[1], [0], [0], [1], [0, 0, 1, 1], [], []>} : vector<32x32xbf16>, vector<32x512xbf16>, vector<32x512xf32> -> vector<32x512xf32>
    %47 = vector.broadcast %44 : vector<32x1xf32> to vector<32x512xf32>
    %48 = arith.addf %46, %47 : vector<32x512xf32>
    %49 = arith.truncf %48 : vector<32x512xf32> to vector<32x512xbf16>
    %cst_29 = arith.constant 0.000000e+00 : bf16
    %50 = vector.broadcast %cst_29 : bf16 to vector<32x512xbf16>
    %51 = arith.cmpf ogt, %49, %50 : vector<32x512xbf16>
    %cst_30 = arith.constant 1.000980e-02 : bf16
    %52 = vector.broadcast %cst_30 : bf16 to vector<32x512xbf16>
    %53 = arith.mulf %52, %49 : vector<32x512xbf16>
    %54 = arith.select %51, %49, %53 : vector<32x512xi1>, vector<32x512xbf16>
    %c128 = arith.constant 128 : index
    %c0_31 = arith.constant 0 : index
    %55 = vector.load %arg5[%c128, %c0_31] : memref<163x1xf32, #tpu.memory_space<vmem>>, vector<32x1xf32>
    %c0_32 = arith.constant 0 : index
    %c0_33 = arith.constant 0 : index
    %56 = vector.load %arg10[%c0_32, %c0_33] : memref<32x32xbf16, #tpu.memory_space<vmem>>, vector<32x32xbf16>
    %cst_34 = arith.constant dense<0.000000e+00> : vector<32x512xf32>
    %57 = tpu.matmul %56, %54, %cst_34 {dimension_numbers = #tpu.dot_dimension_numbers<[1], [0], [0], [1], [0, 0, 1, 1], [], []>} : vector<32x32xbf16>, vector<32x512xbf16>, vector<32x512xf32> -> vector<32x512xf32>
    %58 = vector.broadcast %55 : vector<32x1xf32> to vector<32x512xf32>
    %59 = arith.addf %57, %58 : vector<32x512xf32>
    %60 = arith.truncf %59 : vector<32x512xf32> to vector<32x512xbf16>
    %cst_35 = arith.constant 0.000000e+00 : bf16
    %61 = vector.broadcast %cst_35 : bf16 to vector<32x512xbf16>
    %62 = arith.cmpf ogt, %60, %61 : vector<32x512xbf16>
    %cst_36 = arith.constant 1.000980e-02 : bf16
    %63 = vector.broadcast %cst_36 : bf16 to vector<32x512xbf16>
    %64 = arith.mulf %63, %60 : vector<32x512xbf16>
    %65 = arith.select %62, %60, %64 : vector<32x512xi1>, vector<32x512xbf16>
    %c0_37 = arith.constant 0 : index
    %c0_38 = arith.constant 0 : index
    %66 = vector.load %arg11[%c0_37, %c0_38] : memref<3x32xbf16, #tpu.memory_space<vmem>>, vector<3x32xbf16>
    %cst_39 = arith.constant dense<0.000000e+00> : vector<3x512xf32>
    %67 = tpu.matmul %66, %65, %cst_39 {dimension_numbers = #tpu.dot_dimension_numbers<[1], [0], [0], [1], [0, 0, 1, 1], [], []>} : vector<3x32xbf16>, vector<32x512xbf16>, vector<3x512xf32> -> vector<3x512xf32>
    %c160 = arith.constant 160 : index
    %c0_40 = arith.constant 0 : index
    %68 = vector.load %arg5[%c160, %c0_40] : memref<163x1xf32, #tpu.memory_space<vmem>>, vector<3x1xf32>
    %69 = vector.broadcast %68 : vector<3x1xf32> to vector<3x512xf32>
    %70 = arith.addf %67, %69 : vector<3x512xf32>
    %71 = math.tanh %70 : vector<3x512xf32>
    %cst_41 = arith.constant 2.000000e+00 : f32
    %72 = vector.broadcast %cst_41 : f32 to vector<3x512xf32>
    %73 = arith.mulf %72, %71 : vector<3x512xf32>
    %c0_42 = arith.constant 0 : index
    %c0_43 = arith.constant 0 : index
    %c0_44 = arith.constant 0 : index
    %c0_45 = arith.constant 0 : index
    %74 = vector.load %arg12[%c0_42, %c0_43, %c0_44, %c0_45] : memref<1x1x3x512xf32, #tpu.memory_space<vmem>>, vector<1x1x3x512xf32>
    %75 = vector.shape_cast %74 : vector<1x1x3x512xf32> to vector<3x512xf32>
    %76 = vector.shape_cast %73 : vector<3x512xf32> to vector<1x1x3x512xf32>
    tpu.vector_store %arg12[%c0_42, %c0_43, %c0_44, %c0_45], %76 {strides = array<i32>} : memref<1x1x3x512xf32, #tpu.memory_space<vmem>>, vector<1x1x3x512xf32>,
    return
  }
  func.func @transform_0(%arg0: i32, %arg1: i32, %arg2: i32) -> (i32, i32) {
    %c0_i32 = arith.constant 0 : i32
    %c0_i32_0 = arith.constant 0 : i32
    return %c0_i32, %arg2 : i32, i32
  }
  func.func @transform_1(%arg0: i32, %arg1: i32, %arg2: i32) -> (i32, i32, i32, i32) {
    %c0_i32 = arith.constant 0 : i32
    %c0_i32_0 = arith.constant 0 : i32
    %c0_i32_1 = arith.constant 0 : i32
    return %arg0, %arg1, %c0_i32, %c0_i32_0 : i32, i32, i32, i32
  }
  func.func @transform_2(%arg0: i32, %arg1: i32, %arg2: i32) -> (i32, i32) {
    %c0_i32 = arith.constant 0 : i32
    %c0_i32_0 = arith.constant 0 : i32
    %c0_i32_1 = arith.constant 0 : i32
    return %c0_i32, %c0_i32_0 : i32, i32
  }
  func.func @transform_3(%arg0: i32, %arg1: i32, %arg2: i32) -> (i32, i32) {
    %c0_i32 = arith.constant 0 : i32
    %c0_i32_0 = arith.constant 0 : i32
    %c0_i32_1 = arith.constant 0 : i32
    return %c0_i32, %c0_i32_0 : i32, i32
  }
  func.func @transform_4(%arg0: i32, %arg1: i32, %arg2: i32) -> (i32, i32) {
    %c0_i32 = arith.constant 0 : i32
    %c0_i32_0 = arith.constant 0 : i32
    %c0_i32_1 = arith.constant 0 : i32
    return %c0_i32, %c0_i32_0 : i32, i32
  }
  func.func @transform_5(%arg0: i32, %arg1: i32, %arg2: i32) -> (i32, i32) {
    %c0_i32 = arith.constant 0 : i32
    %c0_i32_0 = arith.constant 0 : i32
    %c0_i32_1 = arith.constant 0 : i32
    return %c0_i32, %c0_i32_0 : i32, i32
  }
  func.func @transform_6(%arg0: i32, %arg1: i32, %arg2: i32) -> (i32, i32) {
    %c0_i32 = arith.constant 0 : i32
    %c0_i32_0 = arith.constant 0 : i32
    %c0_i32_1 = arith.constant 0 : i32
    return %c0_i32, %c0_i32_0 : i32, i32
  }
  func.func @transform_7(%arg0: i32, %arg1: i32, %arg2: i32) -> (i32, i32) {
    %c0_i32 = arith.constant 0 : i32
    %c0_i32_0 = arith.constant 0 : i32
    %c0_i32_1 = arith.constant 0 : i32
    return %c0_i32, %c0_i32_0 : i32, i32
  }
  func.func @transform_8(%arg0: i32, %arg1: i32, %arg2: i32) -> (i32, i32) {
    %c0_i32 = arith.constant 0 : i32
    %c0_i32_0 = arith.constant 0 : i32
    %c0_i32_1 = arith.constant 0 : i32
    return %c0_i32, %c0_i32_0 : i32, i32
  }
  func.func @transform_9(%arg0: i32, %arg1: i32, %arg2: i32) -> (i32, i32, i32, i32) {
    %c0_i32 = arith.constant 0 : i32
    %c0_i32_0 = arith.constant 0 : i32
    return %arg0, %arg1, %c0_i32, %arg2 : i32, i32, i32, i32
  }
}

</mosaic_0001>

<bundles_post_ra>
// kernel: mapping_2d_to_3d.1
= control target key start
LH: loop header
LB: loop body
LE: loop exit
PB: predicated region body
PF: predicated region fallthrough
CT: control target
= control target key end

     0   :  { %s3210_s0 = inlined_call_operand.vmem [shape: bf16[32,1024], index: 0, kind: input, shape index: {}]   ;;  %s3211_s1 = inlined_call_operand.vmem [shape: f32[2,4,32,1], index: 1, kind: input, shape index: {}]   ;;  %s3212_s2 = inlined_call_operand.vmem [shape: f32[163,1], index: 2, kind: input, shape index: {}]   ;;  %s3213_s3 = inlined_call_operand.vmem [shape: bf16[32,32], index: 3, kind: input, shape index: {}]   ;;  %s3214_s4 = inlined_call_operand.vmem [shape: bf16[32,32], index: 4, kind: input, shape index: {}]   ;;  %s3215_s5 = inlined_call_operand.vmem [shape: bf16[32,32], index: 5, kind: input, shape index: {}]   ;;  %s3216_s6 = inlined_call_operand.vmem [shape: bf16[32,32], index: 6, kind: input, shape index: {}]   ;;  %s3217_s7 = inlined_call_operand.vmem [shape: bf16[32,32], index: 7, kind: input, shape index: {}]   ;;  %s3218_s8 = inlined_call_operand.vmem [shape: bf16[3,32], index: 8, kind: input, shape index: {}]   ;;  %s3219_s9 = inlined_call_operand.vmem [shape: f32[2,4,3,1024], index: 9, kind: output, shape index: {}]  }
   0x1   :  { %3220 = sst [smem:[#allocation3_spill]] %s3210_s0 }
   0x2   :  { %3221 = sst [smem:[#allocation4_spill]] %s3211_s1 }
   0x3   :  { %s2390_s30 = smov 0   ;;  %s2392_s10 = smov 0  }
   0x4   :  { %s2394_s11 = smov 0   ;;  %s2396_s12 = smov 0  }
   0x5   :  { %s2398_s13 = smov 0   ;;  %s2400_s14 = smov 0  }
   0x6   :  { %s2402_s15 = smov 0   ;;  %s2404_s16 = smov 0  }
   0x7   :  { %s2406_s17 = smov 0  }
   0x8 LB: > { %s31_s18 = sadd.s32 1, %s2324_s14  ;;  %s34_s19 = sadd.s32 1, %s2328_s15  ;;  %s2336_s17 = sphi %s2406_s17, %s19_s17   ;;  %s2332_s16 = sphi %s2404_s16, %s3373_s16   ;;  %s2328_s15 = sphi %s2402_s15, %s3372_s15   ;;  %s2324_s14 = sphi %s2400_s14, %s3371_s14   ;;  %s2320_s13 = sphi %s2398_s13, %s3370_s13   ;;  %s2316_s12 = sphi %s2396_s12, %s3369_s12   ;;  %s2312_s11 = sphi %s2394_s11, %s3368_s11   ;;  %s2308_s10 = sphi %s2392_s10, %s3367_s10   ;;  %s2304_s30 = sphi %s2390_s30, %s3366_s30  }
   0x9   : > { %p32_p0 = scmp.ge.s32.totalorder %s31_s18, 2  ;;  %s38_s20 = sadd.s32 1, %s2332_s16 }
   0xa   : > { %p52_p1 = scmp.ne.s32.totalorder %s2308_s10, %s2304_s30  ;;  %p53_p2 = scmp.eq.s32.totalorder %s2336_s17, 0 }
   0xb   : > { %s3375_s18 = smov (%p32_p0, %s31_s18), 0  ;;  %s3377_s19 = smov (!%p32_p0, %s34_s19), %s2328_s15 }
   0xc   : > { %s42_s21 = ssub.s32 %s2324_s14, %s3375_s18  ;;  %p36_p3 = scmp.ge.s32.totalorder %s3377_s19, 4 }
   0xd   : > { %p43_p4 = scmp.eq.s32.totalorder %s42_s21, 0  ;;  %s45_s22 = sadd.s32 1, %s2308_s10 }
   0xe   : > { %p54_p5 = por %p53_p2, %p52_p1  ;;  %s3379_s19 = smov (%p36_p3, %s3377_s19), 0 }
   0xf   : > { %s3381_s20 = smov (!%p36_p3, %s38_s20), %s2332_s16  ;;  %p2071_p7 = scmp.ge.s32.totalorder %s2336_s17, 16 }
  0x10   : > { %s2451_s23 = scalar_select %p43_p4, %s2308_s10, %s45_s22  }
  0x11   : > { %p40_p6 = scmp.ge.s32.totalorder %s3381_s20, 2  ;;  %304 = sbr.rel (%p2071_p7) target bundleno = 40 (0x28), region = 44 }
  0x13   : > { %s3383_s20 = smov (%p40_p6, %s3381_s20), 0 }
  0x16   : > { %307 = sbr.rel (!%p54_p5) target bundleno = 40 (0x28), region = 48  ;;  %s309_s24 = sand.u32 (%p54_p5), 1, %s2308_s10  }
  0x17   : > { %s2170_s25 = sshll.u32 (%p54_p5), %s2324_s14, 4  ;;  %s2072_s26 = sshll.u32 (%p54_p5), %s309_s24, 6 }
  0x18   : > { %s3222_s0 = sld [smem:[#allocation3_spill]] (%p54_p5)  ;;  %s311_s21 = scalar_lea.vmem (%p54_p5), [#allocation2], %s2072_s26 }
  0x1e   : > { %s314_s29 = scalar_lea.vmem %s3222_s0, %s2170_s25 }
  0x1f   : > { %v327_v0 = vld [vmem:[%s314_s29] sm:$0xff]  ;;  %v329_v1 = vld [vmem:[%s314_s29 + $0x8] sm:$0xff] }
  0x20   : > { %v331_v2 = vld [vmem:[%s314_s29 + $0x20] sm:$0xff]  ;;  %328 = vst [vmem:[%s311_s21] sm:$0xff] %v327_v0  ;;  %v333_v3 = vld [vmem:[%s314_s29 + $0x28] sm:$0xff] }
  0x21   : > { %330 = vst [vmem:[%s311_s21 + $0x8] sm:$0xff] %v329_v1  ;;  %v335_v4 = vld [vmem:[%s314_s29 + $0x40] sm:$0xff]  ;;  %v337_v5 = vld [vmem:[%s314_s29 + $0x48] sm:$0xff] }
  0x22   : > { %332 = vst [vmem:[%s311_s21 + $0x10] sm:$0xff] %v331_v2  ;;  %v339_v6 = vld [vmem:[%s314_s29 + $0x60] sm:$0xff]  ;;  %v341_v7 = vld [vmem:[%s314_s29 + $0x68] sm:$0xff] }
  0x23   : > { %334 = vst [vmem:[%s311_s21 + $0x18] sm:$0xff] %v333_v3 }
  0x24   : > { %336 = vst [vmem:[%s311_s21 + $0x20] sm:$0xff] %v335_v4 }
  0x25   : > { %338 = vst [vmem:[%s311_s21 + $0x28] sm:$0xff] %v337_v5 }
  0x26   : > { %340 = vst [vmem:[%s311_s21 + $0x30] sm:$0xff] %v339_v6 }
  0x27   : > { %342 = vst [vmem:[%s311_s21 + $0x38] sm:$0xff] %v341_v7 }
  0x28 PF: > { %p2075_p8 = scmp.ge.s32.totalorder %s2336_s17, 1  ;;  %p359_p9 = scmp.lt.s32.totalorder %s2336_s17, 17 }
  0x2a   : > { %p360_p10 = pnand %p2075_p8, %p359_p9 }
  0x2b   : > { %p419_p11 = scmp.lt.s32.totalorder (!%p360_p10), %s2320_s13, 1  ;;  %p421_p12 = scmp.lt.s32.totalorder (!%p360_p10), %s2316_s12, 3 }
  0x2c   : > { %363 = sbr.rel (%p360_p10) target bundleno = 1252 (0x4e4), region = 75  ;;  %s3223_s1 = sld [smem:[#allocation4_spill]] (!%p360_p10) }
  0x2d   : > { %s366_s27 = sand.u32 (!%p360_p10), 1, %s2304_s30  }
  0x31   : > { %v2338_v8 = vmov 0   ;;  %s3385_s13 = smov (!%p419_p11, %s2320_s13), 1  ;;  %s3387_s12 = smov (!%p421_p12, %s2316_s12), 3  ;;  %v611_v17 = vld [vmem:[%s3212_s2] sm:$0xff]  ;;  %v612_v18 = vld [vmem:[%s3212_s2 + $0x8] sm:$0xff]  ;;  %v855_v19 = vld [vmem:[%s3212_s2 + $0x38] sm:$0xff] }
  0x32   : > { %2256 = vset.pattern.permute.xlu1 %v2338_v8  ;;  %2255 = vset.pattern.permute.xlu0 %v2338_v8  ;;  %s2078_s22 = sshll.u32 %s3385_s13, 4  ;;  %s2077_s24 = sshll.u32 %s3387_s12, 2  ;;  %v852_v20 = vld [vmem:[%s3212_s2 + $0x20] sm:$0xff]  ;;  %v1094_v21 = vld [vmem:[%s3212_s2 + $0x50] sm:$0xff]  ;;  %v1095_v22 = vld [vmem:[%s3212_s2 + $0x58] sm:$0xff] }
  0x33   : > { %2257 = vset.pattern.permute.xlu2 %v2338_v8  ;;  %s425_s25 = sadd.s32 %s2078_s22, %s2077_s24  ;;  %v1093_v23 = vld [vmem:[%s3212_s2 + $0x48] sm:$0xff]  ;;  %v1334_v24 = vld [vmem:[%s3212_s2 + $0x70] sm:$0xff]  ;;  %v1332_v25 = vld [vmem:[%s3212_s2 + $0x60] sm:$0xff]  ;;  %v2339_v30 = vmov 839922192   ;;  %s2080_s24 = sshll.u32 %s2312_s11, 2 }
  0x34   : > { %s2079_s26 = sshll.u32 %s425_s25, 3  ;;  %v1333_v26 = vld [vmem:[%s3212_s2 + $0x68] sm:$0xff]  ;;  %v1575_v27 = vld [vmem:[%s3212_s2 + $0x98] sm:$0xff]  ;;  %v1572_v28 = vld [vmem:[%s3212_s2 + $0x80] sm:$0xff]  ;;  %v465_v31 = vunpack.c.l.s4 %v2339_v30  ;;  %p433_p13 = scmp.lt.s32.totalorder %s2080_s24, 7 }
  0x35   : > { %s427_s29 = scalar_lea.vmem %s3223_s1, %s2079_s26  ;;  %v1813_v29 = vld [vmem:[%s3212_s2 + $0xa0] sm:$0x7]  ;;  %s2076_s1 = sshll.u32 %s366_s27, 6 }
  0x36   : > { %v453_v9 = vld [vmem:[%s427_s29 + $0x10] sm:$0xff]  ;;  %v451_v10 = vld [vmem:[%s427_s29] sm:$0xff]  ;;  %v454_v13 = vld [vmem:[%s427_s29 + $0x18] sm:$0xff]  ;;  %v466_v32 = vunpack.c.0.s8 %v465_v31  ;;  %s368_s28 = scalar_lea.vmem [#allocation2], %s2076_s1  ;;  %s3389_s24 = smov (!%p433_p13, %s2080_s24), 7 }
  0x37   : > { %v457_v11 = vpack.c.bf16 %v453_v9, %v453_v9  ;;  %v455_v12 = vpack.c.bf16 %v451_v10, %v451_v10  ;;  %v452_v14 = vld [vmem:[%s427_s29 + $0x8] sm:$0xff]  ;;  %v458_v15 = vpack.c.bf16 %v454_v13, %v454_v13  ;;  %v447_v33 = vld [vmem:[%s368_s28 + $0x20] sm:$0xff]  ;;  %v449_v45 = vld [vmem:[%s368_s28 + $0x30] sm:$0xff]  ;;  %s2081_s25 = sshll.u32 %s3387_s12, 3  ;;  %s2082_s27 = sshll.u32 %s3385_s13, 5 }
  0x38   : > { %v456_v16 = vpack.c.bf16 %v452_v14, %v452_v14  ;;  %v448_v34 = vld [vmem:[%s368_s28 + $0x28] sm:$0xff]  ;;  %v443_v35 = vld [vmem:[%s368_s28] sm:$0xff]  ;;  %v503_v38 = vunpack.c.l.bf16 %v447_v33  ;;  %v504_v39 = vunpack.c.h.bf16 %v447_v33  ;;  %v450_v46 = vld [vmem:[%s368_s28 + $0x38] sm:$0xff]  ;;  %v507_v53 = vunpack.c.l.bf16 %v449_v45  ;;  %s436_s26 = sadd.s32 %s2081_s25, %s3389_s24 }
  0x39   : > { %479 = vperm.xlu0 %2255, %v457_v11   ;;  %461 = vperm.xlu1 %2256, %v455_v12   ;;  %v444_v36 = vld [vmem:[%s368_s28 + $0x8] sm:$0xff]  ;;  %v505_v42 = vunpack.c.l.bf16 %v448_v34  ;;  %v506_v43 = vunpack.c.h.bf16 %v448_v34  ;;  %v495_v47 = vunpack.c.l.bf16 %v443_v35  ;;  %v496_v48 = vunpack.c.h.bf16 %v443_v35  ;;  %v445_v57 = vld [vmem:[%s368_s28 + $0x10] sm:$0xff]  ;;  %v446_v62 = vld [vmem:[%s368_s28 + $0x18] sm:$0xff]  ;;  %s438_s1 = sadd.s32 %s2082_s27, %s436_s26 }
  0x3a   : > { %v497_v49 = vunpack.c.l.bf16 %v444_v36  ;;  %v498_v50 = vunpack.c.h.bf16 %v444_v36  ;;  %v508_v54 = vunpack.c.h.bf16 %v449_v45  ;;  %v509_v55 = vunpack.c.l.bf16 %v450_v46  ;;  %s2083_s28 = sshll.u32 %s438_s1, 2 }
  0x3b   : > { %v510_v56 = vunpack.c.h.bf16 %v450_v46  ;;  %v499_v3 = vunpack.c.l.bf16 %v445_v57  ;;  %v500_v4 = vunpack.c.h.bf16 %v445_v57  ;;  %v501_v9 = vunpack.c.l.bf16 %v446_v62  ;;  %s440_s29 = scalar_lea.vmem %s3219_s9, %s2083_s28 }
  0x3c   : > { %v502_v10 = vunpack.c.h.bf16 %v446_v62 }
  0x41   : > { %488 = vperm.xlu0 %2255, %v458_v15   ;;  %470 = vperm.xlu1 %2256, %v456_v16  }
  0x49   : > { %621 = vperm.xlu0 %2255, %v611_v17   ;;  %626 = vperm.xlu1 %2256, %v612_v18  }
  0x51   : > { %877 = vperm.xlu0 %2255, %v855_v19   ;;  %862 = vperm.xlu1 %2256, %v852_v20  }
  0x59   : > { %1112 = vperm.xlu0 %2255, %v1094_v21   ;;  %1117 = vperm.xlu1 %2256, %v1095_v22  }
  0x61   : > { %1107 = vperm.xlu0 %2255, %v1093_v23   ;;  %1352 = vperm.xlu1 %2256, %v1334_v24  }
  0x69   : > { %1342 = vperm.xlu0 %2255, %v1332_v25   ;;  %1347 = vperm.xlu1 %2256, %v1333_v26   ;;  %v613_v25 = vld [vmem:[%s3212_s2 + $0x10] sm:$0xff] }
  0x6a   : > { %631 = vperm.xlu2 %2257, %v613_v25  }
  0x71   : > { %1597 = vperm.xlu0 %2255, %v1575_v27   ;;  %1582 = vperm.xlu1 %2256, %v1572_v28  }
  0x79   : > { %1816 = vperm.xlu0 %2255, %v1813_v29   ;;  %v854_v29 = vld [vmem:[%s3212_s2 + $0x30] sm:$0xff] }
  0xab   : > { %v480_v37 = vpop.permute.xlu0 %479  ;;  %v462_v40 = vpop.permute.xlu1 %461 }
  0xac   : > { %v485_v41 = vperm.slane %v480_v37, %v466_v32  ;;  %v467_v44 = vperm.slane %v462_v40, %v466_v32 }
  0xae   : > { %v513_v51 = vunpack.c.l.bf16 %v485_v41  ;;  %v511_v52 = vunpack.c.l.bf16 %v467_v44 }
  0xb0   : > { %v523_v58 = vadd.f32 %v513_v51, %v503_v38  ;;  %v524_v59 = vadd.f32 %v513_v51, %v504_v39  ;;  %v525_v60 = vadd.f32 %v513_v51, %v505_v42  ;;  %v526_v61 = vadd.f32 %v513_v51, %v506_v43 }
  0xb1   : > { %v515_v63 = vadd.f32 %v511_v52, %v495_v47  ;;  %v516_v0 = vadd.f32 %v511_v52, %v496_v48  ;;  %v517_v1 = vadd.f32 %v511_v52, %v497_v49  ;;  %v518_v2 = vadd.f32 %v511_v52, %v498_v50  ;;  %v614_v50 = vld [vmem:[%s3212_s2 + $0x18] sm:$0xff] }
  0xb2   : > { %v535_v5 = vpack.c.bf16 %v524_v59, %v523_v58  ;;  %v2516_v6 = vpack.c.bf16 %v526_v61, %v525_v60  ;;  %636 = vperm.xlu2 %2257, %v614_v50   ;;  %v2172_v59 = vld [vmem:[%s3213_s3 + $0x8] sm:$0xff]  ;;  %v1335_v60 = vld [vmem:[%s3212_s2 + $0x78] sm:$0xff] }
  0xb3   : > { %v489_v7 = vpop.permute.xlu0 %488  ;;  %v471_v8 = vpop.permute.xlu1 %470  ;;  %v2518_v11 = vpack.c.bf16 %v516_v0, %v515_v63  ;;  %v2520_v12 = vpack.c.bf16 %v518_v2, %v517_v1 }
  0xb4   : > { %v494_v13 = vperm.slane %v489_v7, %v466_v32  ;;  %v476_v14 = vperm.slane %v471_v8, %v466_v32  ;;  %v547_v15 = vunpack.c.l.bf16 %v535_v5  ;;  %v548_v16 = vunpack.c.h.bf16 %v535_v5 }
  0xb5   : > { %v549_v17 = vunpack.c.l.bf16 %v2516_v6  ;;  %v550_v18 = vunpack.c.h.bf16 %v2516_v6  ;;  %v539_v19 = vunpack.c.l.bf16 %v2518_v11  ;;  %v540_v20 = vunpack.c.h.bf16 %v2518_v11 }
  0xb6   : > { %v514_v21 = vunpack.c.l.bf16 %v494_v13  ;;  %v512_v22 = vunpack.c.l.bf16 %v476_v14  ;;  %vm2526_vm0 = vcmp.gt.f32.partialorder %v547_v15, 0.0  ;;  %vm2530_vm1 = vcmp.gt.f32.partialorder %v548_v16, 0.0 }
  0xb7   : > { %v579_v26 = vmul.f32 0.010009766, %v547_v15  ;;  %v580_v27 = vmul.f32 0.010009766, %v548_v16  ;;  %vm2537_vm2 = vcmp.gt.f32.partialorder %v549_v17, 0.0  ;;  %vm2541_vm3 = vcmp.gt.f32.partialorder %v550_v18, 0.0  ;;  %vm599_vm4 = vmpackc.low %vm2530_vm1, %vm2526_vm0 }
  0xb8   : > { %v527_v30 = vadd.f32 %v514_v21, %v507_v53  ;;  %v528_v31 = vadd.f32 %v514_v21, %v508_v54  ;;  %v529_v32 = vadd.f32 %v514_v21, %v509_v55  ;;  %v530_v33 = vadd.f32 %v514_v21, %v510_v56  ;;  %vm600_vm11 = vmpackc.low %vm2541_vm3, %vm2537_vm2 }
  0xb9   : > { %v519_v34 = vadd.f32 %v512_v22, %v499_v3  ;;  %v520_v35 = vadd.f32 %v512_v22, %v500_v4  ;;  %v521_v36 = vadd.f32 %v512_v22, %v501_v9  ;;  %v522_v37 = vadd.f32 %v512_v22, %v502_v10 }
  0xba   : > { %v537_v38 = vpack.c.bf16 %v528_v31, %v527_v30  ;;  %v591_v39 = vpack.c.bf16 %v580_v27, %v579_v26  ;;  %v538_v40 = vpack.c.bf16 %v530_v33, %v529_v32  ;;  %v581_v41 = vmul.f32 0.010009766, %v549_v17  ;;  %872 = vperm.xlu2 %2257, %v854_v29  }
  0xbb   : > { %v582_v42 = vmul.f32 0.010009766, %v550_v18  ;;  %v2549_v43 = vpack.c.bf16 %v520_v35, %v519_v34  ;;  %vm2551_vm5 = vcmp.gt.f32.partialorder %v539_v19, 0.0  ;;  %vm2555_vm6 = vcmp.gt.f32.partialorder %v540_v20, 0.0 }
  0xbc   : > { %v551_v46 = vunpack.c.l.bf16 %v537_v38  ;;  %v552_v47 = vunpack.c.h.bf16 %v537_v38  ;;  %v607_v48 = vsel %vm599_vm4, %v535_v5, %v591_v39  ;;  %v553_v49 = vunpack.c.l.bf16 %v538_v40  ;;  %vm595_vm0 = vmpackc.low %vm2555_vm6, %vm2551_vm5 }
  0xbd   : > { %v665_v51 = vunpack.c.l.b16 %v607_v48  ;;  %v666_v52 = vunpack.c.h.b16 %v607_v48  ;;  %v554_v53 = vunpack.c.h.bf16 %v538_v40  ;;  %v592_v54 = vpack.c.bf16 %v582_v42, %v581_v41 }
  0xbe   : > { %vm2562_vm7 = vcmp.gt.f32.partialorder %v551_v46, 0.0  ;;  %vm2566_vm8 = vcmp.gt.f32.partialorder %v552_v47, 0.0  ;;  %v583_v57 = vmul.f32 0.010009766, %v551_v46  ;;  %v584_v58 = vmul.f32 0.010009766, %v552_v47 }
  0xbf   : > { %vm2570_vm9 = vcmp.gt.f32.partialorder %v553_v49, 0.0  ;;  %vm2574_vm10 = vcmp.gt.f32.partialorder %v554_v53, 0.0  ;;  %v585_v61 = vmul.f32 0.010009766, %v553_v49  ;;  %v586_v62 = vmul.f32 0.010009766, %v554_v53  ;;  %vm601_vm12 = vmpackc.low %vm2566_vm8, %vm2562_vm7  ;;  %v2171_v49 = vld [vmem:[%s3213_s3] sm:$0xff] }
  0xc0   : > { %v593_v63 = vpack.c.bf16 %v584_v58, %v583_v57  ;;  %v608_v0 = vsel %vm600_vm11, %v2516_v6, %v592_v54  ;;  %v543_v1 = vunpack.c.l.bf16 %v2549_v43  ;;  %v544_v2 = vunpack.c.h.bf16 %v2549_v43  ;;  %vm602_vm13 = vmpackc.low %vm2574_vm10, %vm2570_vm9 }
  0xc1   : > { %v594_v3 = vpack.c.bf16 %v586_v62, %v585_v61  ;;  %v667_v4 = vunpack.c.l.b16 %v608_v0  ;;  %v668_v5 = vunpack.c.h.b16 %v608_v0  ;;  %v571_v7 = vmul.f32 0.010009766, %v539_v19  ;;  %v1574_v61 = vld [vmem:[%s3212_s2 + $0x90] sm:$0xff]  ;;  %v1573_v62 = vld [vmem:[%s3212_s2 + $0x88] sm:$0xff] }
  0xc2   : > { %v609_v8 = vsel %vm601_vm12, %v537_v38, %v593_v63  ;;  %vm2593_vm14 = vcmp.gt.f32.partialorder %v543_v1, 0.0  ;;  %vm2597_vm15 = vcmp.gt.f32.partialorder %v544_v2, 0.0  ;;  %v572_v10 = vmul.f32 0.010009766, %v540_v20 }
  0xc3   : > { %v669_v13 = vunpack.c.l.b16 %v609_v8  ;;  %v670_v14 = vunpack.c.h.b16 %v609_v8  ;;  %v610_v15 = vsel %vm602_vm13, %v538_v40, %v594_v3  ;;  %v575_v16 = vmul.f32 0.010009766, %v543_v1  ;;  %vm597_vm1 = vmpackc.low %vm2597_vm15, %vm2593_vm14  ;;  %v622_v1 = vpop.permute.xlu0 %621 }
  0xc4   : > { %v671_v17 = vunpack.c.l.b16 %v610_v15  ;;  %v672_v18 = vunpack.c.h.b16 %v610_v15  ;;  %v576_v19 = vmul.f32 0.010009766, %v544_v2  ;;  %v587_v21 = vpack.c.bf16 %v572_v10, %v571_v7  ;;  %v627_v7 = vpop.permute.xlu1 %626 }
  0xc5   : > { %v677_v22 = vpack.c.b16 %v669_v13, %v665_v51  ;;  %v678_v23 = vpack.c.b16 %v670_v14, %v666_v52  ;;  %v534_v24 = vpack.c.bf16 %v522_v37, %v521_v36  ;;  %v541_v25 = vunpack.c.l.bf16 %v2520_v12  ;;  %v853_v52 = vld [vmem:[%s3212_s2 + $0x28] sm:$0xff]  ;;  %v632_v13 = vpop.permute.xlu2 %631 }
  0xc6   : > { %v679_v26 = vpack.c.b16 %v671_v17, %v667_v4  ;;  %v680_v20 = vpack.c.b16 %v672_v18, %v668_v5  ;;  %v589_v27 = vpack.c.bf16 %v576_v19, %v575_v16  ;;  %v603_v28 = vsel %vm595_vm0, %v2518_v11, %v587_v21  ;;  %867 = vperm.xlu2 %2257, %v853_v52  }
  0xc7   : > { %702 = vmatpush.bf16.msra.mxu0 %v677_v22  ;;  %721 = vmatpush.bf16.msra.mxu1 %v678_v23  ;;  %v657_v30 = vunpack.c.l.b16 %v603_v28  ;;  %v658_v31 = vunpack.c.h.b16 %v603_v28  ;;  %v542_v32 = vunpack.c.h.bf16 %v2520_v12  ;;  %v545_v33 = vunpack.c.l.bf16 %v534_v24 }
  0xc8   : > { %740 = vmatpush.bf16.msra.mxu2 %v679_v26  ;;  %759 = vmatpush.bf16.msra.mxu3 %v680_v20  ;;  %v605_v11 = vsel %vm597_vm1, %v2549_v43, %v589_v27  ;;  %v546_v34 = vunpack.c.h.bf16 %v534_v24  ;;  %vm2616_vm2 = vcmp.gt.f32.partialorder %v541_v25, 0.0  ;;  %v573_v36 = vmul.f32 0.010009766, %v541_v25 }
  0xc9   : > { %v661_v37 = vunpack.c.l.b16 %v605_v11  ;;  %v662_v38 = vunpack.c.h.b16 %v605_v11  ;;  %vm2620_vm3 = vcmp.gt.f32.partialorder %v542_v32, 0.0  ;;  %vm2624_vm4 = vcmp.gt.f32.partialorder %v545_v33, 0.0 }
  0xca   : > { %vm2628_vm5 = vcmp.gt.f32.partialorder %v546_v34, 0.0  ;;  %v574_v42 = vmul.f32 0.010009766, %v542_v32  ;;  %v577_v43 = vmul.f32 0.010009766, %v545_v33  ;;  %v578_v44 = vmul.f32 0.010009766, %v546_v34  ;;  %vm596_vm6 = vmpackc.low %vm2620_vm3, %vm2616_vm2 }
  0xcb   : > { %v673_v45 = vpack.c.b16 %v661_v37, %v657_v30  ;;  %v674_v46 = vpack.c.b16 %v662_v38, %v658_v31  ;;  %vm598_vm7 = vmpackc.low %vm2628_vm5, %vm2624_vm4  ;;  %vm689_vm8 = vcmask 261120  }
  0xcc   : > { %v588_v47 = vpack.c.bf16 %v574_v42, %v573_v36  ;;  %v590_v48 = vpack.c.bf16 %v578_v44, %v577_v43 }
  0xcd   : > { %703 = vmatpush.bf16.msra.mxu0 %v673_v45  ;;  %722 = vmatpush.bf16.msra.mxu1 %v674_v46 }
  0xce   : > { %v604_v50 = vsel %vm596_vm6, %v2520_v12, %v588_v47  ;;  %v606_v51 = vsel %vm598_vm7, %v534_v24, %v590_v48  ;;  %v1092_v12 = vld [vmem:[%s3212_s2 + $0x40] sm:$0xff] }
  0xcf   : > { %v659_v53 = vunpack.c.l.b16 %v604_v50  ;;  %v663_v54 = vunpack.c.l.b16 %v606_v51  ;;  %v660_v55 = vunpack.c.h.b16 %v604_v50  ;;  %v664_v56 = vunpack.c.h.b16 %v606_v51  ;;  %1102 = vperm.xlu2 %2257, %v1092_v12  }
  0xd0   : > { %2092 = vmatmul.msk.bf16.vlgmr.msra.gmra.mxu0 %vm689_vm8, %v2171_v49  ;;  %2094 = vmatmul.msk.bf16.vlgmr.msra.gmra.mxu1 %vm689_vm8, %v2171_v49 }
  0xd1   : > { %v675_v57 = vpack.c.b16 %v663_v54, %v659_v53  ;;  %v676_v58 = vpack.c.b16 %v664_v56, %v660_v55 }
  0xd3   : > { %741 = vmatpush.bf16.msra.mxu2 %v675_v57  ;;  %760 = vmatpush.bf16.msra.mxu3 %v676_v58 }
  0xd6   : > { %2096 = vmatmul.msk.bf16.vlgmr.msra.gmra.mxu2 %vm689_vm8, %v2171_v49  ;;  %2098 = vmatmul.msk.bf16.vlgmr.msra.gmra.mxu3 %vm689_vm8, %v2171_v49 }
  0xd7   : > { %1357 = vperm.xlu2 %2257, %v1335_v60  }
  0xdf   : > { %1592 = vperm.xlu2 %2257, %v1574_v61  }
  0xe0   : > { %2093 = vmatmul.msk.bf16.gmra.mxu0 %vm689_vm8, %v2172_v59  ;;  %2095 = vmatmul.msk.bf16.gmra.mxu1 %vm689_vm8, %v2172_v59 }
  0xe6   : > { %2097 = vmatmul.msk.bf16.gmra.mxu2 %vm689_vm8, %v2172_v59  ;;  %2099 = vmatmul.msk.bf16.gmra.mxu3 %vm689_vm8, %v2172_v59 }
  0xe7   : > { %1587 = vperm.xlu2 %2257, %v1573_v62  }
 0x10c   : > { %v2670_v31 = vpop.permute.xlu2 %636 }
 0x14d   : > { %v705_v63 = vpop.f32.mrf.mxu0  ;;  %v724_v0 = vpop.f32.mrf.mxu1 }
 0x14e   : > { %v706_v4 = vadd.f32 %v705_v63, %v622_v1  ;;  %v725_v5 = vadd.f32 %v724_v0, %v622_v1 }
 0x150   : > { %v772_v14 = vpack.c.bf16 %v725_v5, %v706_v4 }
 0x152   : > { %v780_v18 = vunpack.c.l.bf16 %v772_v14  ;;  %v781_v19 = vunpack.c.h.bf16 %v772_v14 }
 0x154   : > { %v812_v27 = vmul.f32 0.010009766, %v780_v18  ;;  %v813_v28 = vmul.f32 0.010009766, %v781_v19  ;;  %vm2672_vm9 = vcmp.gt.f32.partialorder %v780_v18, 0.0  ;;  %vm2678_vm10 = vcmp.gt.f32.partialorder %v781_v19, 0.0 }
 0x155   : > { %v707_v2 = vpop.f32.mrf.mxu0  ;;  %v726_v3 = vpop.f32.mrf.mxu1  ;;  %vm836_vm15 = vmpackc.low %vm2678_vm10, %vm2672_vm9 }
 0x156   : > { %v708_v9 = vadd.f32 %v707_v2, %v627_v7  ;;  %v727_v10 = vadd.f32 %v726_v3, %v627_v7  ;;  %v828_v41 = vpack.c.bf16 %v813_v28, %v812_v27 }
 0x158   : > { %v774_v15 = vpack.c.bf16 %v727_v10, %v708_v9  ;;  %v844_v60 = vsel %vm836_vm15, %v772_v14, %v828_v41 }
 0x159   : > { %v743_v8 = vpop.f32.mrf.mxu2  ;;  %v762_v6 = vpop.f32.mrf.mxu3 }
 0x15a   : > { %v784_v24 = vunpack.c.l.bf16 %v774_v15  ;;  %v785_v25 = vunpack.c.h.bf16 %v774_v15  ;;  %v744_v42 = vadd.f32 %v743_v8, %v622_v1  ;;  %v763_v43 = vadd.f32 %v762_v6, %v622_v1 }
 0x15b   : > { %v898_v6 = vunpack.c.l.b16 %v844_v60 }
 0x15c   : > { %v816_v33 = vmul.f32 0.010009766, %v784_v24  ;;  %v817_v11 = vmul.f32 0.010009766, %v785_v25  ;;  %vm2690_vm13 = vcmp.gt.f32.partialorder %v784_v24, 0.0  ;;  %vm2694_vm14 = vcmp.gt.f32.partialorder %v785_v25, 0.0 }
 0x15d   : > { %v710_v16 = vpop.f32.mrf.mxu0  ;;  %v729_v17 = vpop.f32.mrf.mxu1  ;;  %v2702_v12 = vpack.c.bf16 %v763_v43, %v744_v42  ;;  %vm838_vm2 = vmpackc.low %vm2694_vm14, %vm2690_vm13 }
 0x15e   : > { %v711_v21 = vadd.f32 %v710_v16, %v632_v13  ;;  %v730_v22 = vadd.f32 %v729_v17, %v632_v13  ;;  %v830_v54 = vpack.c.bf16 %v817_v11, %v816_v33 }
 0x15f   : > { %v782_v5 = vunpack.c.l.bf16 %v2702_v12  ;;  %v783_v9 = vunpack.c.h.bf16 %v2702_v12 }
 0x160   : > { %v776_v23 = vpack.c.bf16 %v730_v22, %v711_v21  ;;  %v846_v0 = vsel %vm838_vm2, %v774_v15, %v830_v54 }
 0x161   : > { %v745_v26 = vpop.f32.mrf.mxu2  ;;  %v764_v20 = vpop.f32.mrf.mxu3  ;;  %v903_v14 = vunpack.c.h.b16 %v846_v0  ;;  %v814_v32 = vmul.f32 0.010009766, %v782_v5  ;;  %v815_v33 = vmul.f32 0.010009766, %v783_v9  ;;  %vm2743_vm13 = vcmp.gt.f32.partialorder %v782_v5, 0.0 }
 0x162   : > { %v788_v29 = vunpack.c.l.bf16 %v776_v23  ;;  %v789_v30 = vunpack.c.h.bf16 %v776_v23  ;;  %v746_v44 = vadd.f32 %v745_v26, %v627_v7  ;;  %v765_v45 = vadd.f32 %v764_v20, %v627_v7  ;;  %v863_v5 = vpop.permute.xlu1 %862 }
 0x163   : > { %vm799_vm14 = vcmp.gt.f32.partialorder %v783_v9, 0.0  ;;  %v829_v48 = vpack.c.bf16 %v815_v33, %v814_v32 }
 0x164   : > { %v820_v34 = vmul.f32 0.010009766, %v788_v29  ;;  %v821_v35 = vmul.f32 0.010009766, %v789_v30  ;;  %vm2682_vm11 = vcmp.gt.f32.partialorder %v788_v29, 0.0  ;;  %vm2686_vm12 = vcmp.gt.f32.partialorder %v789_v30, 0.0 }
 0x165   : > { %v712_v36 = vpop.f32.mrf.mxu0  ;;  %v731_v37 = vpop.f32.mrf.mxu1  ;;  %v2704_v59 = vpack.c.bf16 %v765_v45, %v746_v44  ;;  %vm840_vm0 = vmpackc.low %vm2686_vm12, %vm2682_vm11  ;;  %v899_v30 = vunpack.c.h.b16 %v844_v60  ;;  %v2173_v44 = vld [vmem:[%s3214_s4] sm:$0xff] }
 0x166   : > { %v713_v38 = vadd.f32 %v712_v36, %v2670_v31  ;;  %v732_v39 = vadd.f32 %v731_v37, %v2670_v31  ;;  %v832_v51 = vpack.c.bf16 %v821_v35, %v820_v34 }
 0x167   : > { %v786_v7 = vunpack.c.l.bf16 %v2704_v59  ;;  %v787_v8 = vunpack.c.h.bf16 %v2704_v59 }
 0x168   : > { %v778_v46 = vpack.c.bf16 %v732_v39, %v713_v38  ;;  %v848_v4 = vsel %vm840_vm0, %v776_v23, %v832_v51  ;;  %v915_v38 = vpack.c.b16 %v903_v14, %v899_v30  ;;  %v2770_v30 = vpop.permute.xlu0 %877 }
 0x169   : > { %v748_v49 = vpop.f32.mrf.mxu2  ;;  %v767_v50 = vpop.f32.mrf.mxu3  ;;  %v906_v15 = vunpack.c.l.b16 %v848_v4  ;;  %v907_v19 = vunpack.c.h.b16 %v848_v4  ;;  %v818_v26 = vmul.f32 0.010009766, %v786_v7  ;;  %v819_v20 = vmul.f32 0.010009766, %v787_v8 }
 0x16a   : > { %v749_v55 = vadd.f32 %v748_v49, %v632_v13  ;;  %v768_v56 = vadd.f32 %v767_v50, %v632_v13  ;;  %v792_v57 = vunpack.c.l.bf16 %v778_v46  ;;  %v793_v58 = vunpack.c.h.bf16 %v778_v46 }
 0x16b   : > { %v902_v13 = vunpack.c.l.b16 %v846_v0  ;;  %vm2728_vm7 = vcmp.gt.f32.partialorder %v786_v7, 0.0  ;;  %vm2732_vm9 = vcmp.gt.f32.partialorder %v787_v8, 0.0  ;;  %v831_v41 = vpack.c.bf16 %v819_v20, %v818_v26 }
 0x16c   : > { %v777_v61 = vpack.c.bf16 %v768_v56, %v749_v55  ;;  %v824_v62 = vmul.f32 0.010009766, %v792_v57  ;;  %v825_v63 = vmul.f32 0.010009766, %v793_v58  ;;  %vm808_vm1 = vcmp.gt.f32.partialorder %v792_v57, 0.0  ;;  %vm839_vm15 = vmpackc.low %vm2732_vm9, %vm2728_vm7 }
 0x16d   : > { %vm809_vm3 = vcmp.gt.f32.partialorder %v793_v58, 0.0  ;;  %v914_v11 = vpack.c.b16 %v902_v13, %v898_v6  ;;  %v847_v50 = vsel %vm839_vm15, %v2704_v59, %v831_v41 }
 0x16e   : > { %v790_v1 = vunpack.c.l.bf16 %v777_v61  ;;  %v791_v2 = vunpack.c.h.bf16 %v777_v61  ;;  %v834_v3 = vpack.c.bf16 %v825_v63, %v824_v62  ;;  %vm842_vm4 = vmpackc.low %vm809_vm3, %vm808_vm1  ;;  %v904_v58 = vunpack.c.l.b16 %v847_v50 }
 0x16f   : > { %vm837_vm1 = vmpackc.low %vm799_vm14, %vm2743_vm13  ;;  %v905_v60 = vunpack.c.h.b16 %v847_v50 }
 0x170   : > { %v850_v10 = vsel %vm842_vm4, %v778_v46, %v834_v3  ;;  %v822_v22 = vmul.f32 0.010009766, %v790_v1  ;;  %v823_v23 = vmul.f32 0.010009766, %v791_v2  ;;  %vm2720_vm5 = vcmp.gt.f32.partialorder %v790_v1, 0.0 }
 0x171   : > { %v750_v16 = vpop.f32.mrf.mxu2  ;;  %v769_v17 = vpop.f32.mrf.mxu3  ;;  %v910_v18 = vunpack.c.l.b16 %v850_v10  ;;  %v911_v21 = vunpack.c.h.b16 %v850_v10  ;;  %vm2724_vm6 = vcmp.gt.f32.partialorder %v791_v2, 0.0  ;;  %v845_v55 = vsel %vm837_vm1, %v2702_v12, %v829_v48  ;;  %v2174_v12 = vld [vmem:[%s3214_s4 + $0x8] sm:$0xff] }
 0x172   : > { %v751_v24 = vadd.f32 %v750_v16, %v2670_v31  ;;  %v770_v25 = vadd.f32 %v769_v17, %v2670_v31  ;;  %v833_v31 = vpack.c.bf16 %v823_v23, %v822_v22  ;;  %vm841_vm12 = vmpackc.low %vm2724_vm6, %vm2720_vm5  ;;  %v901_v62 = vunpack.c.h.b16 %v845_v55  ;;  %v2766_v2 = vpop.permute.xlu2 %872 }
 0x173   : > { %v918_v27 = vpack.c.b16 %v910_v18, %v906_v15  ;;  %v919_v28 = vpack.c.b16 %v911_v21, %v907_v19 }
 0x174   : > { %v779_v29 = vpack.c.bf16 %v770_v25, %v751_v24  ;;  %v849_v47 = vsel %vm841_vm12, %v777_v61, %v833_v31  ;;  %v900_v61 = vunpack.c.l.b16 %v845_v55  ;;  %v917_v0 = vpack.c.b16 %v905_v60, %v901_v62 }
 0x175   : > { %942 = vmatpush.bf16.msrb.mxu0 %v918_v27  ;;  %961 = vmatpush.bf16.msrb.mxu1 %v919_v28  ;;  %v908_v51 = vunpack.c.l.b16 %v849_v47  ;;  %v909_v53 = vunpack.c.h.b16 %v849_v47 }
 0x176   : > { %v794_v35 = vunpack.c.l.bf16 %v779_v29  ;;  %v795_v36 = vunpack.c.h.bf16 %v779_v29  ;;  %v916_v63 = vpack.c.b16 %v904_v58, %v900_v61 }
 0x178   : > { %v826_v42 = vmul.f32 0.010009766, %v794_v35  ;;  %v827_v43 = vmul.f32 0.010009766, %v795_v36  ;;  %vm810_vm10 = vcmp.gt.f32.partialorder %v794_v35, 0.0  ;;  %vm811_vm11 = vcmp.gt.f32.partialorder %v795_v36, 0.0 }
 0x179   : > { %943 = vmatpush.bf16.msrb.mxu0 %v914_v11  ;;  %962 = vmatpush.bf16.msrb.mxu1 %v915_v38  ;;  %vm843_vm0 = vmpackc.low %vm811_vm11, %vm810_vm10 }
 0x17a   : > { %v835_v46 = vpack.c.bf16 %v827_v43, %v826_v42  ;;  %v868_v7 = vpop.permute.xlu2 %867 }
 0x17c   : > { %v851_v49 = vsel %vm843_vm0, %v779_v29, %v835_v46  ;;  %2108 = vmatmul.msk.bf16.vlgmr.msrb.gmra.mxu0 %vm689_vm8, %v2173_v44  ;;  %2110 = vmatmul.msk.bf16.vlgmr.msrb.gmra.mxu1 %vm689_vm8, %v2173_v44 }
 0x17d   : > { %v912_v52 = vunpack.c.l.b16 %v851_v49  ;;  %v913_v54 = vunpack.c.h.b16 %v851_v49 }
 0x17f   : > { %v920_v56 = vpack.c.b16 %v912_v52, %v908_v51  ;;  %v921_v57 = vpack.c.b16 %v913_v54, %v909_v53 }
 0x181   : > { %980 = vmatpush.bf16.msrb.mxu2 %v920_v56  ;;  %999 = vmatpush.bf16.msrb.mxu3 %v921_v57 }
 0x185   : > { %981 = vmatpush.bf16.msrb.mxu2 %v916_v63  ;;  %1000 = vmatpush.bf16.msrb.mxu3 %v917_v0 }
 0x188   : > { %2112 = vmatmul.msk.bf16.vlgmr.msrb.gmra.mxu2 %vm689_vm8, %v2173_v44  ;;  %2114 = vmatmul.msk.bf16.vlgmr.msrb.gmra.mxu3 %vm689_vm8, %v2173_v44 }
 0x18c   : > { %2109 = vmatmul.msk.bf16.gmra.mxu0 %vm689_vm8, %v2174_v12  ;;  %2111 = vmatmul.msk.bf16.gmra.mxu1 %vm689_vm8, %v2174_v12 }
 0x198   : > { %2113 = vmatmul.msk.bf16.gmra.mxu2 %vm689_vm8, %v2174_v12  ;;  %2115 = vmatmul.msk.bf16.gmra.mxu3 %vm689_vm8, %v2174_v12 }
 0x1f9   : > { %v945_v59 = vpop.f32.mrf.mxu0  ;;  %v964_v1 = vpop.f32.mrf.mxu1 }
 0x1fa   : > { %v946_v8 = vadd.f32 %v945_v59, %v863_v5  ;;  %v965_v6 = vadd.f32 %v964_v1, %v863_v5 }
 0x1fc   : > { %v1012_v15 = vpack.c.bf16 %v965_v6, %v946_v8 }
 0x1fe   : > { %v1020_v25 = vunpack.c.l.bf16 %v1012_v15  ;;  %v1021_v26 = vunpack.c.h.bf16 %v1012_v15 }
 0x200   : > { %v1052_v11 = vmul.f32 0.010009766, %v1020_v25  ;;  %v1053_v34 = vmul.f32 0.010009766, %v1021_v26  ;;  %vm2774_vm2 = vcmp.gt.f32.partialorder %v1020_v25, 0.0  ;;  %vm2778_vm3 = vcmp.gt.f32.partialorder %v1021_v26, 0.0 }
 0x201   : > { %v947_v3 = vpop.f32.mrf.mxu0  ;;  %v966_v4 = vpop.f32.mrf.mxu1  ;;  %vm1076_vm12 = vmpackc.low %vm2778_vm3, %vm2774_vm2 }
 0x202   : > { %v948_v9 = vadd.f32 %v947_v3, %v868_v7  ;;  %v967_v10 = vadd.f32 %v966_v4, %v868_v7  ;;  %v1068_v46 = vpack.c.bf16 %v1053_v34, %v1052_v11 }
 0x204   : > { %v1014_v21 = vpack.c.bf16 %v967_v10, %v948_v9 }
 0x206   : > { %v1024_v20 = vunpack.c.l.bf16 %v1014_v21  ;;  %v1025_v27 = vunpack.c.h.bf16 %v1014_v21 }
 0x208   : > { %v1056_v38 = vmul.f32 0.010009766, %v1024_v20  ;;  %v1057_v39 = vmul.f32 0.010009766, %v1025_v27  ;;  %vm2790_vm6 = vcmp.gt.f32.partialorder %v1024_v20, 0.0  ;;  %vm2794_vm7 = vcmp.gt.f32.partialorder %v1025_v27, 0.0 }
 0x209   : > { %v950_v13 = vpop.f32.mrf.mxu0  ;;  %v969_v14 = vpop.f32.mrf.mxu1  ;;  %vm1078_vm13 = vmpackc.low %vm2794_vm7, %vm2790_vm6 }
 0x20a   : > { %v951_v16 = vadd.f32 %v950_v13, %v2766_v2  ;;  %v970_v17 = vadd.f32 %v969_v14, %v2766_v2  ;;  %v1070_v51 = vpack.c.bf16 %v1057_v39, %v1056_v38 }
 0x20b   : > { %v983_v18 = vpop.f32.mrf.mxu2  ;;  %v1002_v19 = vpop.f32.mrf.mxu3 }
 0x20c   : > { %v1016_v22 = vpack.c.bf16 %v970_v17, %v951_v16  ;;  %v984_v60 = vadd.f32 %v983_v18, %v863_v5  ;;  %v1003_v61 = vadd.f32 %v1002_v19, %v863_v5  ;;  %v1086_v1 = vsel %vm1078_vm13, %v1014_v21, %v1070_v51 }
 0x20d   : > { %v1142_v14 = vunpack.c.l.b16 %v1086_v1  ;;  %v1143_v16 = vunpack.c.h.b16 %v1086_v1 }
 0x20e   : > { %v1028_v23 = vunpack.c.l.bf16 %v1016_v22  ;;  %v1029_v24 = vunpack.c.h.bf16 %v1016_v22  ;;  %v1013_v13 = vpack.c.bf16 %v1003_v61, %v984_v60 }
 0x210   : > { %v1060_v32 = vmul.f32 0.010009766, %v1028_v23  ;;  %v1061_v33 = vmul.f32 0.010009766, %v1029_v24  ;;  %vm2782_vm4 = vcmp.gt.f32.partialorder %v1028_v23, 0.0  ;;  %vm2786_vm5 = vcmp.gt.f32.partialorder %v1029_v24, 0.0 }
 0x211   : > { %v952_v28 = vpop.f32.mrf.mxu0  ;;  %v971_v29 = vpop.f32.mrf.mxu1  ;;  %vm1080_vm9 = vmpackc.low %vm2786_vm5, %vm2782_vm4  ;;  %v1022_v21 = vunpack.c.l.bf16 %v1013_v13  ;;  %v1023_v26 = vunpack.c.h.bf16 %v1013_v13 }
 0x212   : > { %v953_v37 = vadd.f32 %v952_v28, %v2770_v30  ;;  %v972_v31 = vadd.f32 %v971_v29, %v2770_v30  ;;  %v1072_v45 = vpack.c.bf16 %v1061_v33, %v1060_v32 }
 0x213   : > { %v985_v35 = vpop.f32.mrf.mxu2  ;;  %v1004_v36 = vpop.f32.mrf.mxu3  ;;  %v1055_v38 = vmul.f32 0.010009766, %v1023_v26  ;;  %vm2847_vm5 = vcmp.gt.f32.partialorder %v1022_v21, 0.0  ;;  %vm1039_vm7 = vcmp.gt.f32.partialorder %v1023_v26, 0.0 }
 0x214   : > { %v1018_v41 = vpack.c.bf16 %v972_v31, %v953_v37  ;;  %v986_v52 = vadd.f32 %v985_v35, %v868_v7  ;;  %v1005_v53 = vadd.f32 %v1004_v36, %v868_v7  ;;  %v1088_v58 = vsel %vm1080_vm9, %v1016_v22, %v1072_v45  ;;  %v2175_v36 = vld [vmem:[%s3215_s5] sm:$0xff] }
 0x215   : > { %v1146_v3 = vunpack.c.l.b16 %v1088_v58  ;;  %v1084_v7 = vsel %vm1076_vm12, %v1012_v15, %v1068_v46  ;;  %v1147_v8 = vunpack.c.h.b16 %v1088_v58  ;;  %v1054_v31 = vmul.f32 0.010009766, %v1022_v21  ;;  %v2878_v21 = vpop.permute.xlu1 %1117 }
 0x216   : > { %v1032_v48 = vunpack.c.l.bf16 %v1018_v41  ;;  %v1033_v49 = vunpack.c.h.bf16 %v1018_v41  ;;  %v1015_v4 = vpack.c.bf16 %v1005_v53, %v986_v52  ;;  %v1138_v25 = vunpack.c.l.b16 %v1084_v7 }
 0x218   : > { %vm2802_vm10 = vcmp.gt.f32.partialorder %v1032_v48, 0.0  ;;  %vm2806_vm11 = vcmp.gt.f32.partialorder %v1033_v49, 0.0  ;;  %v1064_v56 = vmul.f32 0.010009766, %v1032_v48  ;;  %v1065_v57 = vmul.f32 0.010009766, %v1033_v49 }
 0x219   : > { %vm1082_vm14 = vmpackc.low %vm2806_vm11, %vm2802_vm10  ;;  %v1026_v23 = vunpack.c.l.bf16 %v1015_v4  ;;  %v1027_v24 = vunpack.c.h.bf16 %v1015_v4  ;;  %v1154_v27 = vpack.c.b16 %v1142_v14, %v1138_v25  ;;  %v1069_v49 = vpack.c.bf16 %v1055_v38, %v1054_v31  ;;  %v2872_v14 = vpop.permute.xlu2 %1102 }
 0x21a   : > { %v1074_v62 = vpack.c.bf16 %v1065_v57, %v1064_v56  ;;  %vm1077_vm11 = vmpackc.low %vm1039_vm7, %vm2847_vm5 }
 0x21b   : > { %v988_v63 = vpop.f32.mrf.mxu2  ;;  %v1007_v0 = vpop.f32.mrf.mxu3  ;;  %v1058_v34 = vmul.f32 0.010009766, %v1026_v23  ;;  %v1059_v35 = vmul.f32 0.010009766, %v1027_v24  ;;  %vm2837_vm1 = vcmp.gt.f32.partialorder %v1026_v23, 0.0  ;;  %vm2841_vm2 = vcmp.gt.f32.partialorder %v1027_v24, 0.0 }
 0x21c   : > { %v989_v12 = vadd.f32 %v988_v63, %v2766_v2  ;;  %v1008_v59 = vadd.f32 %v1007_v0, %v2766_v2  ;;  %v1090_v5 = vsel %vm1082_vm14, %v1018_v41, %v1074_v62  ;;  %v1139_v2 = vunpack.c.h.b16 %v1084_v7  ;;  %vm1079_vm9 = vmpackc.low %vm2841_vm2, %vm2837_vm1  ;;  %v2870_v7 = vpop.permute.xlu0 %1112 }
 0x21d   : > { %v1150_v6 = vunpack.c.l.b16 %v1090_v5  ;;  %v1151_v9 = vunpack.c.h.b16 %v1090_v5  ;;  %v1071_v45 = vpack.c.bf16 %v1059_v35, %v1058_v34  ;;  %v1085_v58 = vsel %vm1077_vm11, %v1013_v13, %v1069_v49 }
 0x21e   : > { %v1017_v10 = vpack.c.bf16 %v1008_v59, %v989_v12  ;;  %v1155_v28 = vpack.c.b16 %v1143_v16, %v1139_v2  ;;  %v1140_v0 = vunpack.c.l.b16 %v1085_v58  ;;  %v1141_v12 = vunpack.c.h.b16 %v1085_v58 }
 0x21f   : > { %v1158_v19 = vpack.c.b16 %v1150_v6, %v1146_v3  ;;  %v1159_v22 = vpack.c.b16 %v1151_v9, %v1147_v8  ;;  %v1087_v53 = vsel %vm1079_vm9, %v1015_v4, %v1071_v45  ;;  %v2176_v3 = vld [vmem:[%s3215_s5 + $0x8] sm:$0xff] }
 0x220   : > { %v1030_v17 = vunpack.c.l.bf16 %v1017_v10  ;;  %v1031_v18 = vunpack.c.h.bf16 %v1017_v10  ;;  %v1144_v62 = vunpack.c.l.b16 %v1087_v53  ;;  %v1145_v63 = vunpack.c.h.b16 %v1087_v53 }
 0x221   : > { %1182 = vmatpush.bf16.msra.mxu0 %v1158_v19  ;;  %1201 = vmatpush.bf16.msra.mxu1 %v1159_v22 }
 0x222   : > { %v1062_v29 = vmul.f32 0.010009766, %v1030_v17  ;;  %v1063_v32 = vmul.f32 0.010009766, %v1031_v18  ;;  %vm2829_vm15 = vcmp.gt.f32.partialorder %v1030_v17, 0.0  ;;  %vm2833_vm0 = vcmp.gt.f32.partialorder %v1031_v18, 0.0 }
 0x223   : > { %v990_v15 = vpop.f32.mrf.mxu2  ;;  %v1009_v20 = vpop.f32.mrf.mxu3  ;;  %vm1081_vm6 = vmpackc.low %vm2833_vm0, %vm2829_vm15  ;;  %v1156_v59 = vpack.c.b16 %v1144_v62, %v1140_v0  ;;  %v1157_v1 = vpack.c.b16 %v1145_v63, %v1141_v12 }
 0x224   : > { %v991_v33 = vadd.f32 %v990_v15, %v2770_v30  ;;  %v1010_v11 = vadd.f32 %v1009_v20, %v2770_v30  ;;  %v1073_v30 = vpack.c.bf16 %v1063_v32, %v1062_v29  ;;  %v1108_v9 = vpop.permute.xlu0 %1107 }
 0x225   : > { %1183 = vmatpush.bf16.msra.mxu0 %v1154_v27  ;;  %1202 = vmatpush.bf16.msra.mxu1 %v1155_v28 }
 0x226   : > { %v1019_v37 = vpack.c.bf16 %v1010_v11, %v991_v33  ;;  %v1089_v50 = vsel %vm1081_vm6, %v1017_v10, %v1073_v30 }
 0x227   : > { %v1148_v54 = vunpack.c.l.b16 %v1089_v50  ;;  %v1149_v55 = vunpack.c.h.b16 %v1089_v50 }
 0x228   : > { %v1034_v41 = vunpack.c.l.bf16 %v1019_v37  ;;  %v1035_v42 = vunpack.c.h.bf16 %v1019_v37  ;;  %2124 = vmatmul.msk.bf16.vlgmr.msra.gmra.mxu0 %vm689_vm8, %v2175_v36  ;;  %2126 = vmatmul.msk.bf16.vlgmr.msra.gmra.mxu1 %vm689_vm8, %v2175_v36 }
 0x22a   : > { %vm1050_vm3 = vcmp.gt.f32.partialorder %v1034_v41, 0.0  ;;  %vm1051_vm4 = vcmp.gt.f32.partialorder %v1035_v42, 0.0  ;;  %v1066_v46 = vmul.f32 0.010009766, %v1034_v41  ;;  %v1067_v47 = vmul.f32 0.010009766, %v1035_v42 }
 0x22b   : > { %vm1083_vm10 = vmpackc.low %vm1051_vm4, %vm1050_vm3 }
 0x22c   : > { %v1075_v51 = vpack.c.bf16 %v1067_v47, %v1066_v46 }
 0x22e   : > { %v1091_v52 = vsel %vm1083_vm10, %v1019_v37, %v1075_v51 }
 0x22f   : > { %v1152_v56 = vunpack.c.l.b16 %v1091_v52  ;;  %v1153_v57 = vunpack.c.h.b16 %v1091_v52 }
 0x231   : > { %v1160_v60 = vpack.c.b16 %v1152_v56, %v1148_v54  ;;  %v1161_v61 = vpack.c.b16 %v1153_v57, %v1149_v55 }
 0x233   : > { %1220 = vmatpush.bf16.msra.mxu2 %v1160_v60  ;;  %1239 = vmatpush.bf16.msra.mxu3 %v1161_v61 }
 0x237   : > { %1221 = vmatpush.bf16.msra.mxu2 %v1156_v59  ;;  %1240 = vmatpush.bf16.msra.mxu3 %v1157_v1 }
 0x238   : > { %2125 = vmatmul.msk.bf16.gmra.mxu0 %vm689_vm8, %v2176_v3  ;;  %2127 = vmatmul.msk.bf16.gmra.mxu1 %vm689_vm8, %v2176_v3 }
 0x23a   : > { %2128 = vmatmul.msk.bf16.vlgmr.msra.gmra.mxu2 %vm689_vm8, %v2175_v36  ;;  %2130 = vmatmul.msk.bf16.vlgmr.msra.gmra.mxu3 %vm689_vm8, %v2175_v36 }
 0x24a   : > { %2129 = vmatmul.msk.bf16.gmra.mxu2 %vm689_vm8, %v2176_v3  ;;  %2131 = vmatmul.msk.bf16.gmra.mxu3 %vm689_vm8, %v2176_v3 }
 0x2a5   : > { %v1185_v4 = vpop.f32.mrf.mxu0  ;;  %v1204_v5 = vpop.f32.mrf.mxu1 }
 0x2a6   : > { %v1186_v16 = vadd.f32 %v1185_v4, %v2872_v14  ;;  %v1205_v17 = vadd.f32 %v1204_v5, %v2872_v14 }
 0x2a8   : > { %v1252_v2 = vpack.c.bf16 %v1205_v17, %v1186_v16 }
 0x2aa   : > { %v1260_v32 = vunpack.c.l.bf16 %v1252_v2  ;;  %v1261_v33 = vunpack.c.h.bf16 %v1252_v2 }
 0x2ac   : > { %v1292_v30 = vmul.f32 0.010009766, %v1260_v32  ;;  %v1293_v41 = vmul.f32 0.010009766, %v1261_v33  ;;  %vm1276_vm4 = vcmp.gt.f32.partialorder %v1260_v32, 0.0  ;;  %vm1277_vm5 = vcmp.gt.f32.partialorder %v1261_v33, 0.0 }
 0x2ad   : > { %v1187_v8 = vpop.f32.mrf.mxu0  ;;  %v1206_v6 = vpop.f32.mrf.mxu1  ;;  %vm1316_vm7 = vmpackc.low %vm1277_vm5, %vm1276_vm4 }
 0x2ae   : > { %v1188_v10 = vadd.f32 %v1187_v8, %v1108_v9  ;;  %v1207_v13 = vadd.f32 %v1206_v6, %v1108_v9  ;;  %v1308_v54 = vpack.c.bf16 %v1293_v41, %v1292_v30 }
 0x2b0   : > { %v1254_v24 = vpack.c.bf16 %v1207_v13, %v1188_v10  ;;  %v1324_v12 = vsel %vm1316_vm7, %v1252_v2, %v1308_v54 }
 0x2b2   : > { %v1264_v26 = vunpack.c.l.bf16 %v1254_v24  ;;  %v1265_v15 = vunpack.c.h.bf16 %v1254_v24 }
 0x2b4   : > { %v1296_v37 = vmul.f32 0.010009766, %v1264_v26  ;;  %v1297_v31 = vmul.f32 0.010009766, %v1265_v15  ;;  %vm2882_vm12 = vcmp.gt.f32.partialorder %v1264_v26, 0.0  ;;  %vm2886_vm13 = vcmp.gt.f32.partialorder %v1265_v15, 0.0 }
 0x2b5   : > { %v1190_v18 = vpop.f32.mrf.mxu0  ;;  %v1209_v19 = vpop.f32.mrf.mxu1  ;;  %vm1318_vm2 = vmpackc.low %vm2886_vm13, %vm2882_vm12 }
 0x2b6   : > { %v1191_v22 = vadd.f32 %v1190_v18, %v2870_v7  ;;  %v1210_v23 = vadd.f32 %v1209_v19, %v2870_v7  ;;  %v1310_v46 = vpack.c.bf16 %v1297_v31, %v1296_v37  ;;  %v1379_v18 = vunpack.c.h.b16 %v1324_v12 }
 0x2b8   : > { %v1256_v25 = vpack.c.bf16 %v1210_v23, %v1191_v22  ;;  %v1326_v57 = vsel %vm1318_vm2, %v1254_v24, %v1310_v46 }
 0x2b9   : > { %v1382_v59 = vunpack.c.l.b16 %v1326_v57  ;;  %v1383_v1 = vunpack.c.h.b16 %v1326_v57  ;;  %v2178_v57 = vld [vmem:[%s3216_s6 + $0x8] sm:$0xff] }
 0x2ba   : > { %v1268_v20 = vunpack.c.l.bf16 %v1256_v25  ;;  %v1269_v27 = vunpack.c.h.bf16 %v1256_v25 }
 0x2bb   : > { %v1395_v24 = vpack.c.b16 %v1383_v1, %v1379_v18 }
 0x2bc   : > { %v1300_v38 = vmul.f32 0.010009766, %v1268_v20  ;;  %v1301_v39 = vmul.f32 0.010009766, %v1269_v27  ;;  %vm2890_vm14 = vcmp.gt.f32.partialorder %v1268_v20, 0.0  ;;  %vm1285_vm15 = vcmp.gt.f32.partialorder %v1269_v27, 0.0 }
 0x2bd   : > { %v1223_v28 = vpop.f32.mrf.mxu2  ;;  %v1242_v29 = vpop.f32.mrf.mxu3  ;;  %vm1320_vm3 = vmpackc.low %vm1285_vm15, %vm2890_vm14 }
 0x2be   : > { %v1192_v11 = vpop.f32.mrf.mxu0  ;;  %v1211_v34 = vpop.f32.mrf.mxu1  ;;  %v1312_v48 = vpack.c.bf16 %v1301_v39, %v1300_v38  ;;  %v1224_v3 = vadd.f32 %v1223_v28, %v2872_v14  ;;  %v1243_v4 = vadd.f32 %v1242_v29, %v2872_v14  ;;  %v2907_v14 = vld [vmem:[%s3216_s6] sm:$0xff] }
 0x2bf   : > { %v1193_v35 = vadd.f32 %v1192_v11, %v2878_v21  ;;  %v1212_v36 = vadd.f32 %v1211_v34, %v2878_v21 }
 0x2c0   : > { %v1328_v55 = vsel %vm1320_vm3, %v1256_v25, %v1312_v48  ;;  %v1253_v22 = vpack.c.bf16 %v1243_v4, %v1224_v3  ;;  %v2956_v4 = vpop.permute.xlu1 %1352 }
 0x2c1   : > { %v1258_v40 = vpack.c.bf16 %v1212_v36, %v1193_v35  ;;  %v1386_v61 = vunpack.c.l.b16 %v1328_v55  ;;  %v1387_v62 = vunpack.c.h.b16 %v1328_v55 }
 0x2c2   : > { %v1263_v20 = vunpack.c.h.bf16 %v1253_v22 }
 0x2c3   : > { %v1272_v44 = vunpack.c.l.bf16 %v1258_v40  ;;  %v1273_v45 = vunpack.c.h.bf16 %v1258_v40 }
 0x2c4   : > { %v1295_v31 = vmul.f32 0.010009766, %v1263_v20 }
 0x2c5   : > { %vm1288_vm0 = vcmp.gt.f32.partialorder %v1272_v44, 0.0  ;;  %vm1289_vm1 = vcmp.gt.f32.partialorder %v1273_v45, 0.0  ;;  %v1304_v49 = vmul.f32 0.010009766, %v1272_v44  ;;  %v1305_v50 = vmul.f32 0.010009766, %v1273_v45  ;;  %v1225_v51 = vpop.f32.mrf.mxu2  ;;  %v1244_v52 = vpop.f32.mrf.mxu3 }
 0x2c6   : > { %vm1322_vm6 = vmpackc.low %vm1289_vm1, %vm1288_vm0  ;;  %v1226_v63 = vadd.f32 %v1225_v51, %v1108_v9  ;;  %v1245_v0 = vadd.f32 %v1244_v52, %v1108_v9  ;;  %v1378_v9 = vunpack.c.l.b16 %v1324_v12  ;;  %vm1279_vm1 = vcmp.gt.f32.partialorder %v1263_v20, 0.0  ;;  %v2968_v20 = vpop.permute.xlu2 %1357 }
 0x2c7   : > { %v1314_v53 = vpack.c.bf16 %v1305_v50, %v1304_v49 }
 0x2c8   : > { %v1255_v17 = vpack.c.bf16 %v1245_v0, %v1226_v63  ;;  %v1394_v23 = vpack.c.b16 %v1382_v59, %v1378_v9 }
 0x2c9   : > { %v1330_v56 = vsel %vm1322_vm6, %v1258_v40, %v1314_v53 }
 0x2ca   : > { %v1390_v58 = vunpack.c.l.b16 %v1330_v56  ;;  %v1391_v60 = vunpack.c.h.b16 %v1330_v56  ;;  %v1266_v26 = vunpack.c.l.bf16 %v1255_v17  ;;  %v1267_v15 = vunpack.c.h.bf16 %v1255_v17 }
 0x2cc   : > { %v1398_v6 = vpack.c.b16 %v1390_v58, %v1386_v61  ;;  %v1399_v10 = vpack.c.b16 %v1391_v60, %v1387_v62  ;;  %v1298_v34 = vmul.f32 0.010009766, %v1266_v26  ;;  %v1299_v35 = vmul.f32 0.010009766, %v1267_v15 }
 0x2cd   : > { %v1228_v5 = vpop.f32.mrf.mxu2  ;;  %v1247_v8 = vpop.f32.mrf.mxu3  ;;  %vm2923_vm11 = vcmp.gt.f32.partialorder %v1266_v26, 0.0  ;;  %vm2927_vm12 = vcmp.gt.f32.partialorder %v1267_v15, 0.0 }
 0x2ce   : > { %v1229_v13 = vadd.f32 %v1228_v5, %v2870_v7  ;;  %v1248_v16 = vadd.f32 %v1247_v8, %v2870_v7  ;;  %1422 = vmatpush.bf16.msrb.mxu0 %v1398_v6  ;;  %1441 = vmatpush.bf16.msrb.mxu1 %v1399_v10  ;;  %v1262_v7 = vunpack.c.l.bf16 %v1253_v22  ;;  %v1311_v43 = vpack.c.bf16 %v1299_v35, %v1298_v34  ;;  %vm1319_vm2 = vmpackc.low %vm2927_vm12, %vm2923_vm11  ;;  %v2958_v6 = vpop.permute.xlu1 %1347 }
 0x2d0   : > { %v1257_v19 = vpack.c.bf16 %v1248_v16, %v1229_v13  ;;  %v1294_v37 = vmul.f32 0.010009766, %v1262_v7  ;;  %vm2931_vm15 = vcmp.gt.f32.partialorder %v1262_v7, 0.0  ;;  %v1327_v51 = vsel %vm1319_vm2, %v1255_v17, %v1311_v43  ;;  %v2962_v16 = vpop.permute.xlu0 %1342 }
 0x2d1   : > { %vm1317_vm4 = vmpackc.low %vm1279_vm1, %vm2931_vm15  ;;  %v1384_v61 = vunpack.c.l.b16 %v1327_v51  ;;  %v1385_v62 = vunpack.c.h.b16 %v1327_v51 }
 0x2d2   : > { %v1270_v25 = vunpack.c.l.bf16 %v1257_v19  ;;  %v1271_v2 = vunpack.c.h.bf16 %v1257_v19  ;;  %1423 = vmatpush.bf16.msrb.mxu0 %v1394_v23  ;;  %1442 = vmatpush.bf16.msrb.mxu1 %v1395_v24  ;;  %v1309_v47 = vpack.c.bf16 %v1295_v31, %v1294_v37 }
 0x2d4   : > { %v1302_v29 = vmul.f32 0.010009766, %v1270_v25  ;;  %v1303_v32 = vmul.f32 0.010009766, %v1271_v2  ;;  %vm2915_vm9 = vcmp.gt.f32.partialorder %v1270_v25, 0.0  ;;  %vm2919_vm10 = vcmp.gt.f32.partialorder %v1271_v2, 0.0 }
 0x2d5   : > { %v1230_v27 = vpop.f32.mrf.mxu2  ;;  %v1249_v28 = vpop.f32.mrf.mxu3  ;;  %2140 = vmatmul.msk.bf16.vlgmr.msrb.gmra.mxu0 %vm689_vm8, %v2907_v14  ;;  %2142 = vmatmul.msk.bf16.vlgmr.msrb.gmra.mxu1 %vm689_vm8, %v2907_v14  ;;  %vm1321_vm0 = vmpackc.low %vm2919_vm10, %vm2915_vm9  ;;  %v1325_v56 = vsel %vm1317_vm4, %v1253_v22, %v1309_v47 }
 0x2d6   : > { %v1231_v33 = vadd.f32 %v1230_v27, %v2878_v21  ;;  %v1250_v11 = vadd.f32 %v1249_v28, %v2878_v21  ;;  %v1313_v21 = vpack.c.bf16 %v1303_v32, %v1302_v29  ;;  %v1380_v63 = vunpack.c.l.b16 %v1325_v56 }
 0x2d7   : > { %v1381_v0 = vunpack.c.h.b16 %v1325_v56 }
 0x2d8   : > { %v1259_v36 = vpack.c.bf16 %v1250_v11, %v1231_v33  ;;  %v1329_v48 = vsel %vm1321_vm0, %v1257_v19, %v1313_v21  ;;  %v1396_v12 = vpack.c.b16 %v1384_v61, %v1380_v63 }
 0x2d9   : > { %v1388_v52 = vunpack.c.l.b16 %v1329_v48  ;;  %v1389_v53 = vunpack.c.h.b16 %v1329_v48  ;;  %v1397_v59 = vpack.c.b16 %v1385_v62, %v1381_v0 }
 0x2da   : > { %v1274_v40 = vunpack.c.l.bf16 %v1259_v36  ;;  %v1275_v30 = vunpack.c.h.bf16 %v1259_v36 }
 0x2dc   : > { %vm1290_vm13 = vcmp.gt.f32.partialorder %v1274_v40, 0.0  ;;  %vm1291_vm14 = vcmp.gt.f32.partialorder %v1275_v30, 0.0  ;;  %v1306_v44 = vmul.f32 0.010009766, %v1274_v40  ;;  %v1307_v45 = vmul.f32 0.010009766, %v1275_v30 }
 0x2dd   : > { %vm1323_vm3 = vmpackc.low %vm1291_vm14, %vm1290_vm13 }
 0x2de   : > { %v1315_v49 = vpack.c.bf16 %v1307_v45, %v1306_v44 }
 0x2e0   : > { %v1331_v50 = vsel %vm1323_vm3, %v1259_v36, %v1315_v49 }
 0x2e1   : > { %v1392_v54 = vunpack.c.l.b16 %v1331_v50  ;;  %v1393_v55 = vunpack.c.h.b16 %v1331_v50 }
 0x2e3   : > { %v1400_v58 = vpack.c.b16 %v1392_v54, %v1388_v52  ;;  %v1401_v60 = vpack.c.b16 %v1393_v55, %v1389_v53 }
 0x2e5   : > { %1460 = vmatpush.bf16.msrb.mxu2 %v1400_v58  ;;  %1479 = vmatpush.bf16.msrb.mxu3 %v1401_v60 }
 0x2e6   : > { %2141 = vmatmul.msk.bf16.gmra.mxu0 %vm689_vm8, %v2178_v57  ;;  %2143 = vmatmul.msk.bf16.gmra.mxu1 %vm689_vm8, %v2178_v57 }
 0x2e9   : > { %1461 = vmatpush.bf16.msrb.mxu2 %v1396_v12  ;;  %1480 = vmatpush.bf16.msrb.mxu3 %v1397_v59 }
 0x2ec   : > { %2144 = vmatmul.msk.bf16.vlgmr.msrb.gmra.mxu2 %vm689_vm8, %v2907_v14  ;;  %2146 = vmatmul.msk.bf16.vlgmr.msrb.gmra.mxu3 %vm689_vm8, %v2907_v14 }
 0x2fc   : > { %2145 = vmatmul.msk.bf16.gmra.mxu2 %vm689_vm8, %v2178_v57  ;;  %2147 = vmatmul.msk.bf16.gmra.mxu3 %vm689_vm8, %v2178_v57 }
 0x352   : > { %v1425_v1 = vpop.f32.mrf.mxu0  ;;  %v1444_v3 = vpop.f32.mrf.mxu1 }
 0x353   : > { %v1426_v17 = vadd.f32 %v1425_v1, %v2962_v16  ;;  %v1445_v9 = vadd.f32 %v1444_v3, %v2962_v16 }
 0x355   : > { %v1492_v2 = vpack.c.bf16 %v1445_v9, %v1426_v17 }
 0x357   : > { %v1500_v27 = vunpack.c.l.bf16 %v1492_v2  ;;  %v1501_v28 = vunpack.c.h.bf16 %v1492_v2 }
 0x359   : > { %v1532_v38 = vmul.f32 0.010009766, %v1500_v27  ;;  %v1533_v39 = vmul.f32 0.010009766, %v1501_v28  ;;  %vm2988_vm12 = vcmp.gt.f32.partialorder %v1500_v27, 0.0  ;;  %vm2996_vm14 = vcmp.gt.f32.partialorder %v1501_v28, 0.0 }
 0x35a   : > { %v1427_v5 = vpop.f32.mrf.mxu0  ;;  %v1446_v8 = vpop.f32.mrf.mxu1  ;;  %vm1556_vm1 = vmpackc.low %vm2996_vm14, %vm2988_vm12 }
 0x35b   : > { %v1428_v10 = vadd.f32 %v1427_v5, %v2958_v6  ;;  %v1447_v13 = vadd.f32 %v1446_v8, %v2958_v6  ;;  %v1548_v52 = vpack.c.bf16 %v1533_v39, %v1532_v38 }
 0x35d   : > { %v1494_v24 = vpack.c.bf16 %v1447_v13, %v1428_v10  ;;  %v1564_v0 = vsel %vm1556_vm1, %v1492_v2, %v1548_v52 }
 0x35e   : > { %v1618_v5 = vunpack.c.l.b16 %v1564_v0  ;;  %v1619_v8 = vunpack.c.h.b16 %v1564_v0 }
 0x35f   : > { %v1504_v15 = vunpack.c.l.bf16 %v1494_v24  ;;  %v1505_v7 = vunpack.c.h.bf16 %v1494_v24 }
 0x361   : > { %v1536_v36 = vmul.f32 0.010009766, %v1504_v15  ;;  %v1537_v37 = vmul.f32 0.010009766, %v1505_v7  ;;  %vm2980_vm7 = vcmp.gt.f32.partialorder %v1504_v15, 0.0  ;;  %vm2984_vm9 = vcmp.gt.f32.partialorder %v1505_v7, 0.0 }
 0x362   : > { %vm1558_vm15 = vmpackc.low %vm2984_vm9, %vm2980_vm7 }
 0x363   : > { %v1430_v18 = vpop.f32.mrf.mxu0  ;;  %v1449_v19 = vpop.f32.mrf.mxu1  ;;  %v1550_v47 = vpack.c.bf16 %v1537_v37, %v1536_v36 }
 0x364   : > { %v1431_v22 = vadd.f32 %v1430_v18, %v2956_v4  ;;  %v1450_v23 = vadd.f32 %v1449_v19, %v2956_v4  ;;  %v3013_v18 = vld [vmem:[%s3217_s7] sm:$0xff] }
 0x365   : > { %v1566_v56 = vsel %vm1558_vm15, %v1494_v24, %v1550_v47  ;;  %v2180_v47 = vld [vmem:[%s3217_s7 + $0x8] sm:$0xff] }
 0x366   : > { %v1496_v25 = vpack.c.bf16 %v1450_v23, %v1431_v22  ;;  %v1622_v1 = vunpack.c.l.b16 %v1566_v56  ;;  %v1623_v3 = vunpack.c.h.b16 %v1566_v56 }
 0x368   : > { %v1508_v14 = vunpack.c.l.bf16 %v1496_v25  ;;  %v1509_v26 = vunpack.c.h.bf16 %v1496_v25  ;;  %v1634_v17 = vpack.c.b16 %v1622_v1, %v1618_v5  ;;  %v1635_v9 = vpack.c.b16 %v1623_v3, %v1619_v8 }
 0x36a   : > { %v1540_v33 = vmul.f32 0.010009766, %v1508_v14  ;;  %v1541_v11 = vmul.f32 0.010009766, %v1509_v26  ;;  %vm2972_vm5 = vcmp.gt.f32.partialorder %v1508_v14, 0.0  ;;  %vm2976_vm6 = vcmp.gt.f32.partialorder %v1509_v26, 0.0 }
 0x36b   : > { %v1432_v29 = vpop.f32.mrf.mxu0  ;;  %v1451_v32 = vpop.f32.mrf.mxu1  ;;  %vm1560_vm13 = vmpackc.low %vm2976_vm6, %vm2972_vm5 }
 0x36c   : > { %v1433_v34 = vadd.f32 %v1432_v29, %v2968_v20  ;;  %v1452_v35 = vadd.f32 %v1451_v32, %v2968_v20  ;;  %v1552_v42 = vpack.c.bf16 %v1541_v11, %v1540_v33 }
 0x36e   : > { %v1498_v31 = vpack.c.bf16 %v1452_v35, %v1433_v34  ;;  %v1568_v53 = vsel %vm1560_vm13, %v1496_v25, %v1552_v42 }
 0x36f   : > { %v1463_v40 = vpop.f32.mrf.mxu2  ;;  %v1482_v30 = vpop.f32.mrf.mxu3  ;;  %v1626_v57 = vunpack.c.l.b16 %v1568_v53  ;;  %v1627_v58 = vunpack.c.h.b16 %v1568_v53 }
 0x370   : > { %v1512_v43 = vunpack.c.l.bf16 %v1498_v31  ;;  %v1513_v44 = vunpack.c.h.bf16 %v1498_v31  ;;  %v1464_v19 = vadd.f32 %v1463_v40, %v2962_v16  ;;  %v1483_v22 = vadd.f32 %v1482_v30, %v2962_v16 }
 0x372   : > { %vm1528_vm10 = vcmp.gt.f32.partialorder %v1512_v43, 0.0  ;;  %vm1529_vm11 = vcmp.gt.f32.partialorder %v1513_v44, 0.0  ;;  %v1544_v48 = vmul.f32 0.010009766, %v1512_v43  ;;  %v1545_v49 = vmul.f32 0.010009766, %v1513_v44 }
 0x373   : > { %vm1562_vm0 = vmpackc.low %vm1529_vm11, %vm1528_vm10  ;;  %v1493_v26 = vpack.c.bf16 %v1483_v22, %v1464_v19 }
 0x374   : > { %v1554_v54 = vpack.c.bf16 %v1545_v49, %v1544_v48 }
 0x375   : > { %v1502_v28 = vunpack.c.l.bf16 %v1493_v26  ;;  %v1503_v29 = vunpack.c.h.bf16 %v1493_v26 }
 0x376   : > { %v1570_v55 = vsel %vm1562_vm0, %v1498_v31, %v1554_v54 }
 0x377   : > { %v1630_v60 = vunpack.c.l.b16 %v1570_v55  ;;  %v1631_v61 = vunpack.c.h.b16 %v1570_v55  ;;  %v1465_v62 = vpop.f32.mrf.mxu2  ;;  %v1484_v63 = vpop.f32.mrf.mxu3  ;;  %v1534_v38 = vmul.f32 0.010009766, %v1502_v28  ;;  %v1535_v39 = vmul.f32 0.010009766, %v1503_v29 }
 0x378   : > { %v1466_v10 = vadd.f32 %v1465_v62, %v2958_v6  ;;  %v1485_v13 = vadd.f32 %v1484_v63, %v2958_v6  ;;  %vm3044_vm9 = vcmp.gt.f32.partialorder %v1502_v28, 0.0  ;;  %vm3052_vm11 = vcmp.gt.f32.partialorder %v1503_v29, 0.0 }
 0x379   : > { %v1638_v12 = vpack.c.b16 %v1630_v60, %v1626_v57  ;;  %v1639_v59 = vpack.c.b16 %v1631_v61, %v1627_v58  ;;  %v1549_v50 = vpack.c.bf16 %v1535_v39, %v1534_v38  ;;  %vm1557_vm14 = vmpackc.low %vm3052_vm11, %vm3044_vm9 }
 0x37a   : > { %v1495_v6 = vpack.c.bf16 %v1485_v13, %v1466_v10  ;;  %v3072_v10 = vpop.permute.xlu2 %1592 }
 0x37b   : > { %1662 = vmatpush.bf16.msra.mxu0 %v1638_v12  ;;  %1681 = vmatpush.bf16.msra.mxu1 %v1639_v59  ;;  %v1565_v60 = vsel %vm1557_vm14, %v1493_v26, %v1549_v50 }
 0x37c   : > { %v1506_v16 = vunpack.c.l.bf16 %v1495_v6  ;;  %v1507_v27 = vunpack.c.h.bf16 %v1495_v6  ;;  %v1620_v12 = vunpack.c.l.b16 %v1565_v60  ;;  %v1621_v59 = vunpack.c.h.b16 %v1565_v60 }
 0x37e   : > { %v1538_v36 = vmul.f32 0.010009766, %v1506_v16  ;;  %v1539_v37 = vmul.f32 0.010009766, %v1507_v27  ;;  %vm3033_vm4 = vcmp.gt.f32.partialorder %v1506_v16, 0.0  ;;  %vm3037_vm5 = vcmp.gt.f32.partialorder %v1507_v27, 0.0 }
 0x37f   : > { %v1468_v23 = vpop.f32.mrf.mxu2  ;;  %v1487_v24 = vpop.f32.mrf.mxu3  ;;  %1663 = vmatpush.bf16.msra.mxu0 %v1634_v17  ;;  %1682 = vmatpush.bf16.msra.mxu1 %v1635_v9  ;;  %vm1559_vm12 = vmpackc.low %vm3037_vm5, %vm3033_vm4 }
 0x380   : > { %v1469_v25 = vadd.f32 %v1468_v23, %v2956_v4  ;;  %v1488_v2 = vadd.f32 %v1487_v24, %v2956_v4  ;;  %v1551_v44 = vpack.c.bf16 %v1539_v37, %v1538_v36  ;;  %v3078_v23 = vpop.permute.xlu1 %1582 }
 0x382   : > { %v1497_v14 = vpack.c.bf16 %v1488_v2, %v1469_v25  ;;  %2156 = vmatmul.msk.bf16.vlgmr.msra.gmra.mxu0 %vm689_vm8, %v3013_v18  ;;  %2158 = vmatmul.msk.bf16.vlgmr.msra.gmra.mxu1 %vm689_vm8, %v3013_v18  ;;  %v1567_v54 = vsel %vm1559_vm12, %v1495_v6, %v1551_v44  ;;  %v3074_v9 = vpop.permute.xlu2 %1587 }
 0x383   : > { %v1624_v63 = vunpack.c.l.b16 %v1567_v54  ;;  %v1625_v0 = vunpack.c.h.b16 %v1567_v54 }
 0x384   : > { %v1510_v15 = vunpack.c.l.bf16 %v1497_v14  ;;  %v1511_v7 = vunpack.c.h.bf16 %v1497_v14 }
 0x385   : > { %v1636_v1 = vpack.c.b16 %v1624_v63, %v1620_v12  ;;  %v1637_v3 = vpack.c.b16 %v1625_v0, %v1621_v59 }
 0x386   : > { %v1542_v11 = vmul.f32 0.010009766, %v1510_v15  ;;  %v1543_v34 = vmul.f32 0.010009766, %v1511_v7  ;;  %vm3025_vm2 = vcmp.gt.f32.partialorder %v1510_v15, 0.0  ;;  %vm3029_vm3 = vcmp.gt.f32.partialorder %v1511_v7, 0.0 }
 0x387   : > { %v1470_v32 = vpop.f32.mrf.mxu2  ;;  %v1489_v33 = vpop.f32.mrf.mxu3  ;;  %vm1561_vm10 = vmpackc.low %vm3029_vm3, %vm3025_vm2 }
 0x388   : > { %v1471_v4 = vadd.f32 %v1470_v32, %v2968_v20  ;;  %v1490_v35 = vadd.f32 %v1489_v33, %v2968_v20  ;;  %v1553_v30 = vpack.c.bf16 %v1543_v34, %v1542_v11  ;;  %v3084_v32 = vpop.permute.xlu0 %1597 }
 0x38a   : > { %v1499_v31 = vpack.c.bf16 %v1490_v35, %v1471_v4  ;;  %v1569_v51 = vsel %vm1561_vm10, %v1497_v14, %v1553_v30 }
 0x38b   : > { %v1628_v55 = vunpack.c.l.b16 %v1569_v51  ;;  %v1629_v56 = vunpack.c.h.b16 %v1569_v51 }
 0x38c   : > { %v1514_v41 = vunpack.c.l.bf16 %v1499_v31  ;;  %v1515_v42 = vunpack.c.h.bf16 %v1499_v31 }
 0x38e   : > { %vm1530_vm6 = vcmp.gt.f32.partialorder %v1514_v41, 0.0  ;;  %vm1531_vm7 = vcmp.gt.f32.partialorder %v1515_v42, 0.0  ;;  %v1546_v45 = vmul.f32 0.010009766, %v1514_v41  ;;  %v1547_v46 = vmul.f32 0.010009766, %v1515_v42 }
 0x38f   : > { %vm1563_vm13 = vmpackc.low %vm1531_vm7, %vm1530_vm6 }
 0x390   : > { %v1555_v52 = vpack.c.bf16 %v1547_v46, %v1546_v45 }
 0x392   : > { %v1571_v53 = vsel %vm1563_vm13, %v1499_v31, %v1555_v52  ;;  %2157 = vmatmul.msk.bf16.gmra.mxu0 %vm689_vm8, %v2180_v47  ;;  %2159 = vmatmul.msk.bf16.gmra.mxu1 %vm689_vm8, %v2180_v47 }
 0x393   : > { %v1632_v57 = vunpack.c.l.b16 %v1571_v53  ;;  %v1633_v58 = vunpack.c.h.b16 %v1571_v53 }
 0x395   : > { %v1640_v61 = vpack.c.b16 %v1632_v57, %v1628_v55  ;;  %v1641_v62 = vpack.c.b16 %v1633_v58, %v1629_v56 }
 0x397   : > { %1700 = vmatpush.bf16.msra.mxu2 %v1640_v61  ;;  %1719 = vmatpush.bf16.msra.mxu3 %v1641_v62 }
 0x39b   : > { %1701 = vmatpush.bf16.msra.mxu2 %v1636_v1  ;;  %1720 = vmatpush.bf16.msra.mxu3 %v1637_v3 }
 0x39e   : > { %2160 = vmatmul.msk.bf16.vlgmr.msra.gmra.mxu2 %vm689_vm8, %v3013_v18  ;;  %2162 = vmatmul.msk.bf16.vlgmr.msra.gmra.mxu3 %vm689_vm8, %v3013_v18 }
 0x3ae   : > { %2161 = vmatmul.msk.bf16.gmra.mxu2 %vm689_vm8, %v2180_v47  ;;  %2163 = vmatmul.msk.bf16.gmra.mxu3 %vm689_vm8, %v2180_v47 }
 0x3ff   : > { %v1665_v5 = vpop.f32.mrf.mxu0  ;;  %v1684_v8 = vpop.f32.mrf.mxu1 }
 0x400   : > { %v1666_v18 = vadd.f32 %v1665_v5, %v3078_v23  ;;  %v1685_v24 = vadd.f32 %v1684_v8, %v3078_v23 }
 0x402   : > { %v1732_v7 = vpack.c.bf16 %v1685_v24, %v1666_v18  ;;  %v3127_v18 = vld [vmem:[%s3218_s8] sm:$0x3] }
 0x404   : > { %v1740_v33 = vunpack.c.l.bf16 %v1732_v7  ;;  %v1741_v11 = vunpack.c.h.bf16 %v1732_v7 }
 0x406   : > { %v1772_v40 = vmul.f32 0.010009766, %v1740_v33  ;;  %v1773_v30 = vmul.f32 0.010009766, %v1741_v11  ;;  %vm3104_vm5 = vcmp.gt.f32.partialorder %v1740_v33, 0.0  ;;  %vm3112_vm7 = vcmp.gt.f32.partialorder %v1741_v11, 0.0 }
 0x407   : > { %v1667_v13 = vpop.f32.mrf.mxu0  ;;  %v1686_v17 = vpop.f32.mrf.mxu1  ;;  %vm1796_vm11 = vmpackc.low %vm3112_vm7, %vm3104_vm5 }
 0x408   : > { %v1668_v19 = vadd.f32 %v1667_v13, %v3074_v9  ;;  %v1687_v22 = vadd.f32 %v1686_v17, %v3074_v9  ;;  %v1788_v52 = vpack.c.bf16 %v1773_v30, %v1772_v40 }
 0x40a   : > { %v1734_v26 = vpack.c.bf16 %v1687_v22, %v1668_v19  ;;  %v1804_v0 = vsel %vm1796_vm11, %v1732_v7, %v1788_v52 }
 0x40b   : > { %v1827_v5 = vunpack.c.l.b16 %v1804_v0  ;;  %v1828_v8 = vunpack.c.h.b16 %v1804_v0 }
 0x40c   : > { %v1744_v28 = vunpack.c.l.bf16 %v1734_v26  ;;  %v1745_v29 = vunpack.c.h.bf16 %v1734_v26 }
 0x40e   : > { %v1776_v38 = vmul.f32 0.010009766, %v1744_v28  ;;  %v1777_v39 = vmul.f32 0.010009766, %v1745_v29  ;;  %vm3096_vm1 = vcmp.gt.f32.partialorder %v1744_v28, 0.0  ;;  %vm3100_vm2 = vcmp.gt.f32.partialorder %v1745_v29, 0.0 }
 0x40f   : > { %v1670_v25 = vpop.f32.mrf.mxu0  ;;  %v1689_v2 = vpop.f32.mrf.mxu1  ;;  %vm1798_vm9 = vmpackc.low %vm3100_vm2, %vm3096_vm1 }
 0x410   : > { %v1671_v6 = vadd.f32 %v1670_v25, %v3072_v10  ;;  %v1690_v14 = vadd.f32 %v1689_v2, %v3072_v10  ;;  %v1790_v47 = vpack.c.bf16 %v1777_v39, %v1776_v38 }
 0x412   : > { %v1736_v15 = vpack.c.bf16 %v1690_v14, %v1671_v6  ;;  %v1806_v58 = vsel %vm1798_vm9, %v1734_v26, %v1790_v47 }
 0x413   : > { %v1831_v1 = vunpack.c.l.b16 %v1806_v58  ;;  %v1832_v3 = vunpack.c.h.b16 %v1806_v58 }
 0x414   : > { %v1748_v16 = vunpack.c.l.bf16 %v1736_v15  ;;  %v1749_v27 = vunpack.c.h.bf16 %v1736_v15 }
 0x415   : > { %v1843_v19 = vpack.c.b16 %v1831_v1, %v1827_v5  ;;  %v1844_v22 = vpack.c.b16 %v1832_v3, %v1828_v8  ;;  %v1817_v5 = vpop.permute.xlu0 %1816 }
 0x416   : > { %v1780_v35 = vmul.f32 0.010009766, %v1748_v16  ;;  %v1781_v36 = vmul.f32 0.010009766, %v1749_v27  ;;  %vm3088_vm15 = vcmp.gt.f32.partialorder %v1748_v16, 0.0  ;;  %vm3092_vm0 = vcmp.gt.f32.partialorder %v1749_v27, 0.0 }
 0x417   : > { %v1672_v34 = vpop.f32.mrf.mxu0  ;;  %v1691_v4 = vpop.f32.mrf.mxu1  ;;  %vm1800_vm6 = vmpackc.low %vm3092_vm0, %vm3088_vm15 }
 0x418   : > { %v1673_v37 = vadd.f32 %v1672_v34, %v3084_v32  ;;  %v1692_v31 = vadd.f32 %v1691_v4, %v3084_v32  ;;  %v1792_v43 = vpack.c.bf16 %v1781_v36, %v1780_v35 }
 0x41a   : > { %v1738_v21 = vpack.c.bf16 %v1692_v31, %v1673_v37  ;;  %v1808_v53 = vsel %vm1800_vm6, %v1736_v15, %v1792_v43 }
 0x41b   : > { %v1835_v60 = vunpack.c.l.b16 %v1808_v53  ;;  %v1836_v61 = vunpack.c.h.b16 %v1808_v53 }
 0x41c   : > { %v1752_v20 = vunpack.c.l.bf16 %v1738_v21  ;;  %v1753_v44 = vunpack.c.h.bf16 %v1738_v21 }
 0x41e   : > { %vm1768_vm3 = vcmp.gt.f32.partialorder %v1752_v20, 0.0  ;;  %vm1769_vm4 = vcmp.gt.f32.partialorder %v1753_v44, 0.0  ;;  %v1784_v48 = vmul.f32 0.010009766, %v1752_v20  ;;  %v1785_v49 = vmul.f32 0.010009766, %v1753_v44 }
 0x41f   : > { %vm1802_vm10 = vmpackc.low %vm1769_vm4, %vm1768_vm3 }
 0x420   : > { %v1794_v54 = vpack.c.bf16 %v1785_v49, %v1784_v48 }
 0x421   : > { %v1703_v55 = vpop.f32.mrf.mxu2  ;;  %v1722_v56 = vpop.f32.mrf.mxu3 }
 0x422   : > { %v1810_v57 = vsel %vm1802_vm10, %v1738_v21, %v1794_v54  ;;  %v1704_v2 = vadd.f32 %v1703_v55, %v3078_v23  ;;  %v1723_v6 = vadd.f32 %v1722_v56, %v3078_v23 }
 0x423   : > { %v1839_v62 = vunpack.c.l.b16 %v1810_v57  ;;  %v1840_v63 = vunpack.c.h.b16 %v1810_v57 }
 0x424   : > { %v1733_v28 = vpack.c.bf16 %v1723_v6, %v1704_v2 }
 0x425   : > { %v1847_v12 = vpack.c.b16 %v1839_v62, %v1835_v60  ;;  %v1848_v59 = vpack.c.b16 %v1840_v63, %v1836_v61 }
 0x426   : > { %v1742_v4 = vunpack.c.l.bf16 %v1733_v28  ;;  %v1743_v35 = vunpack.c.h.bf16 %v1733_v28 }
 0x427   : > { %1868 = vmatpush.bf16.msrb.mxu0 %v1847_v12  ;;  %1881 = vmatpush.bf16.msrb.mxu1 %v1848_v59 }
 0x428   : > { %v1774_v40 = vmul.f32 0.010009766, %v1742_v4  ;;  %v1775_v30 = vmul.f32 0.010009766, %v1743_v35  ;;  %vm3157_vm2 = vcmp.gt.f32.partialorder %v1742_v4, 0.0  ;;  %vm1759_vm4 = vcmp.gt.f32.partialorder %v1743_v35, 0.0 }
 0x429   : > { %v1705_v13 = vpop.f32.mrf.mxu2  ;;  %v1724_v17 = vpop.f32.mrf.mxu3  ;;  %vm1797_vm7 = vmpackc.low %vm1759_vm4, %vm3157_vm2 }
 0x42a   : > { %v1706_v24 = vadd.f32 %v1705_v13, %v3074_v9  ;;  %v1725_v25 = vadd.f32 %v1724_v17, %v3074_v9  ;;  %v1789_v50 = vpack.c.bf16 %v1775_v30, %v1774_v40 }
 0x42b   : > { %1869 = vmatpush.bf16.msrb.mxu0 %v1843_v19  ;;  %1882 = vmatpush.bf16.msrb.mxu1 %v1844_v22 }
 0x42c   : > { %v1735_v16 = vpack.c.bf16 %v1725_v25, %v1706_v24  ;;  %v1805_v60 = vsel %vm1797_vm7, %v1733_v28, %v1789_v50 }
 0x42d   : > { %v1829_v12 = vunpack.c.l.b16 %v1805_v60  ;;  %v1830_v59 = vunpack.c.h.b16 %v1805_v60 }
 0x42e   : > { %2164 = vmatmul.msk.bf16.vlgmr.msrb.gmra.mxu0 %vm689_vm8, %v3127_v18  ;;  %2165 = vmatmul.msk.bf16.vlgmr.msrb.gmra.mxu1 %vm689_vm8, %v3127_v18  ;;  %v1746_v11 = vunpack.c.l.bf16 %v1735_v16  ;;  %v1747_v34 = vunpack.c.h.bf16 %v1735_v16 }
 0x430   : > { %v1778_v39 = vmul.f32 0.010009766, %v1746_v11  ;;  %v1779_v21 = vmul.f32 0.010009766, %v1747_v34  ;;  %vm3149_vm14 = vcmp.gt.f32.partialorder %v1746_v11, 0.0  ;;  %vm3153_vm15 = vcmp.gt.f32.partialorder %v1747_v34, 0.0 }
 0x431   : > { %v1708_v14 = vpop.f32.mrf.mxu2  ;;  %v1727_v26 = vpop.f32.mrf.mxu3  ;;  %vm1799_vm5 = vmpackc.low %vm3153_vm15, %vm3149_vm14 }
 0x432   : > { %v1709_v15 = vadd.f32 %v1708_v14, %v3072_v10  ;;  %v1728_v7 = vadd.f32 %v1727_v26, %v3072_v10  ;;  %v1791_v46 = vpack.c.bf16 %v1779_v21, %v1778_v39 }
 0x434   : > { %v1737_v27 = vpack.c.bf16 %v1728_v7, %v1709_v15  ;;  %v1807_v54 = vsel %vm1799_vm5, %v1735_v16, %v1791_v46 }
 0x435   : > { %v1833_v63 = vunpack.c.l.b16 %v1807_v54  ;;  %v1834_v0 = vunpack.c.h.b16 %v1807_v54 }
 0x436   : > { %v1750_v29 = vunpack.c.l.bf16 %v1737_v27  ;;  %v1751_v33 = vunpack.c.h.bf16 %v1737_v27 }
 0x437   : > { %v1845_v1 = vpack.c.b16 %v1833_v63, %v1829_v12  ;;  %v1846_v3 = vpack.c.b16 %v1834_v0, %v1830_v59 }
 0x438   : > { %v1782_v37 = vmul.f32 0.010009766, %v1750_v29  ;;  %v1783_v31 = vmul.f32 0.010009766, %v1751_v33  ;;  %vm3141_vm12 = vcmp.gt.f32.partialorder %v1750_v29, 0.0  ;;  %vm3145_vm13 = vcmp.gt.f32.partialorder %v1751_v33, 0.0 }
 0x439   : > { %v1710_v9 = vpop.f32.mrf.mxu2  ;;  %v1729_v36 = vpop.f32.mrf.mxu3  ;;  %vm1801_vm3 = vmpackc.low %vm3145_vm13, %vm3141_vm12 }
 0x43a   : > { %v1711_v23 = vadd.f32 %v1710_v9, %v3084_v32  ;;  %v1730_v38 = vadd.f32 %v1729_v36, %v3084_v32  ;;  %v1793_v43 = vpack.c.bf16 %v1783_v31, %v1782_v37 }
 0x43c   : > { %v1739_v10 = vpack.c.bf16 %v1730_v38, %v1711_v23  ;;  %v1809_v51 = vsel %vm1801_vm3, %v1737_v27, %v1793_v43 }
 0x43d   : > { %v1837_v55 = vunpack.c.l.b16 %v1809_v51  ;;  %v1838_v56 = vunpack.c.h.b16 %v1809_v51 }
 0x43e   : > { %v1754_v20 = vunpack.c.l.bf16 %v1739_v10  ;;  %v1755_v44 = vunpack.c.h.bf16 %v1739_v10 }
 0x440   : > { %vm1770_vm0 = vcmp.gt.f32.partialorder %v1754_v20, 0.0  ;;  %vm1771_vm1 = vcmp.gt.f32.partialorder %v1755_v44, 0.0  ;;  %v1786_v47 = vmul.f32 0.010009766, %v1754_v20  ;;  %v1787_v48 = vmul.f32 0.010009766, %v1755_v44 }
 0x441   : > { %vm1803_vm6 = vmpackc.low %vm1771_vm1, %vm1770_vm0 }
 0x442   : > { %v1795_v52 = vpack.c.bf16 %v1787_v48, %v1786_v47 }
 0x444   : > { %v1811_v53 = vsel %vm1803_vm6, %v1739_v10, %v1795_v52 }
 0x445   : > { %v1841_v57 = vunpack.c.l.b16 %v1811_v53  ;;  %v1842_v58 = vunpack.c.h.b16 %v1811_v53 }
 0x447   : > { %v1849_v61 = vpack.c.b16 %v1841_v57, %v1837_v55  ;;  %v1850_v62 = vpack.c.b16 %v1842_v58, %v1838_v56 }
 0x449   : > { %1894 = vmatpush.bf16.msrb.mxu2 %v1849_v61  ;;  %1907 = vmatpush.bf16.msrb.mxu3 %v1850_v62 }
 0x44d   : > { %1895 = vmatpush.bf16.msrb.mxu2 %v1845_v1  ;;  %1908 = vmatpush.bf16.msrb.mxu3 %v1846_v3 }
 0x450   : > { %2166 = vmatmul.msk.bf16.vlgmr.msrb.gmra.mxu2 %vm689_vm8, %v3127_v18  ;;  %2167 = vmatmul.msk.bf16.vlgmr.msrb.gmra.mxu3 %vm689_vm8, %v3127_v18  ;;  %vm1928_vm8 = vcmask 1043456  }
 0x4ab   : > { %v1871_v8 = vpop.f32.mrf.mxu0  ;;  %v1884_v13 = vpop.f32.mrf.mxu1 }
 0x4ac   : > { %v1872_v17 = vadd.f32 %v1871_v8, %v1817_v5  ;;  %v1885_v19 = vadd.f32 %v1884_v13, %v1817_v5 }
 0x4ae   : > { %2258 = vtanh.f32 %v1872_v17 }
 0x4af   : > { %2260 = vtanh.f32 %v1885_v19 }
 0x4b3   : > { %v1886_v22 = vpop.f32.mrf.mxu1  ;;  %v1873_v24 = vpop.f32.mrf.mxu0 }
 0x4b4   : > { %v2259_v25 = vpop.eup %2258 }
 0x4b5   : > { %v2261_v2 = vpop.eup %2260  ;;  %v1918_v6 = vmul.f32 2.0, %v2259_v25 }
 0x4b6   : > { %v1919_v18 = vmul.f32 2.0, %v2261_v2 }
 0x4b8   : > { %v1926_v14 = vrot.slane %v1919_v18, 4 }
 0x4ba   : > { %v1929_v26 = vsel %vm1928_vm8, %v1918_v6, %v1926_v14 }
 0x4bb   : > { %1933 = vst [vmem:[%s440_s29] sm:$0x77] %v1929_v26 }
 0x4d3   : > { %v1897_v15 = vpop.f32.mrf.mxu2  ;;  %v1910_v7 = vpop.f32.mrf.mxu3 }
 0x4d4   : > { %v1898_v16 = vadd.f32 %v1897_v15, %v1817_v5  ;;  %v1911_v27 = vadd.f32 %v1910_v7, %v1817_v5 }
 0x4d6   : > { %2262 = vtanh.f32 %v1898_v16 }
 0x4d7   : > { %2264 = vtanh.f32 %v1911_v27 }
 0x4db   : > { %v1912_v28 = vpop.f32.mrf.mxu3  ;;  %v1899_v29 = vpop.f32.mrf.mxu2 }
 0x4dc   : > { %v2263_v33 = vpop.eup %2262 }
 0x4dd   : > { %v2265_v11 = vpop.eup %2264  ;;  %v1920_v4 = vmul.f32 2.0, %v2263_v33 }
 0x4de   : > { %v1921_v34 = vmul.f32 2.0, %v2265_v11 }
 0x4e0   : > { %v1927_v35 = vrot.slane %v1921_v34, 4 }
 0x4e2   : > { %v1930_v9 = vsel %vm1928_vm8, %v1920_v4, %v1927_v35 }
 0x4e3   : > { %1934 = vst [vmem:[%s440_s29 + $0x8] sm:$0x77] %v1930_v9 }
 0x4e4 PF: > { %s19_s17 = sadd.s32 1, %s2336_s17   ;;  %s3366_s30 = smov %s2308_s10 }
 0x4e5   : > { %p16_p0 = scmp.ge.s32.totalorder %s19_s17, 18   ;;  %s3367_s10 = smov %s2451_s23 }
 0x4e6   : > { %s3368_s11 = smov %s2324_s14  ;;  %s3369_s12 = smov %s2328_s15 }
 0x4e7   : > { %s3370_s13 = smov %s2332_s16  ;;  %s3371_s14 = smov %s3375_s18 }
 0x4e8   : > { %s3372_s15 = smov %s3379_s19  ;;  %s3373_s16 = smov %s3383_s20 }
 0x4e9   :  { %18 = sbr.rel (!%p16_p0) target bundleno = 8 (0x8), region = 117 }

</bundles_post_ra>
